<compile_context>
chip_gen: v7x
topology: tpu7x:2x2x1
jax: 0.10.0
libtpu: 0.0.40
codegen_flags: <defaults>
</compile_context>

<pallas_src>
from functools import partial

import jax
import jax.numpy as jnp
from jax.experimental import pallas as pl
from jax.experimental.pallas import tpu as pltpu

# ---- module hyper-parameters (defaults of CharEmbedding.__init__) ----------
VOCAB = 100                 # char_embedding_input_dim
EMBED_DIM = 8               # char_embedding_output_dim
FILTERS = [100, 100, 100]   # char_conv_filters
KERNELS = [3, 4, 5]         # char_conv_kernel_size

F_PAD = 128                 # filter count padded to a full lane group
MIN_TILE = 16               # bf16 sublane packing granule for the row tile


def _round_up(x, m):
    return (x + m - 1) // m * m


def char_conv_kernel(x_ref, w_ref, b_ref, o_ref, *, positions, f_pad, chunk_pos):
    """Chunked Toeplitz matmul + running max-over-time + bias, one row tile.

    x_ref : [tile_n, W*C]             embedded chars, flattened (bf16)
    w_ref : [W*C, sum_i P_i*f_pad]    block-Toeplitz conv weights (bf16)
    b_ref : [1, n_convs*f_pad]        per-conv bias (f32, zero-padded lanes)
    o_ref : [tile_n, n_convs*f_pad]   pooled features at 128-aligned offsets
    """
    x = x_ref[...]
    col = 0
    for i, p in enumerate(positions):
        acc = None
        # Walk the temporal positions of conv i in 128*chunk_pos-lane chunks:
        # one fat MXU matmul per chunk, folded straight into a running max so
        # the full [tile_n, sum_i P_i*128] result is never materialized.
        for t0 in range(0, p, chunk_pos):
            npos = min(chunk_pos, p - t0)
            lo = col + t0 * f_pad
            y = jnp.dot(x, w_ref[:, lo:lo + npos * f_pad],
                        preferred_element_type=jnp.float32)
            for t in range(npos):
                seg = y[:, t * f_pad:(t + 1) * f_pad]
                acc = seg if acc is None else jnp.maximum(acc, seg)
        # Bias is position-invariant: add once after pooling (f32).
        o_ref[:, i * f_pad:(i + 1) * f_pad] = (
            acc + b_ref[:, i * f_pad:(i + 1) * f_pad])
        col += p * f_pad


def char_embedding_forward(x_idx, emb_table, conv_ws, conv_bs, *,
                           tile_n=1024, chunk_pos=4):
    """x_idx: int32 [B, S, W]; returns f32 [B, S, sum(FILTERS)]."""
    B, S, W = x_idx.shape
    C = emb_table.shape[1]
    N = B * S
    n_convs = len(conv_ws)
    positions = tuple(W - k + 1 for k in KERNELS)

    # ---- glue (plain JAX): embedding gather directly in bf16 ----
    emb = jnp.take(emb_table.astype(jnp.bfloat16), x_idx, axis=0)   # [B,S,W,C]
    x_flat = emb.reshape(N, W * C)                                   # bf16

    # ---- tile sizing: multiple of 16 (bf16), and >= 2 grid steps so the
    # "parallel" row axis can shard across both v7x TensorCores. ----
    tile_n = _round_up(max(tile_n, MIN_TILE), MIN_TILE)
    half = _round_up(max((N + 1) // 2, MIN_TILE), MIN_TILE)
    tile_n = min(tile_n, half)
    n_pad = max(_round_up(N, tile_n), 2 * tile_n)
    if n_pad != N:
        x_flat = jnp.pad(x_flat, ((0, n_pad - N), (0, 0)))

    # ---- build block-Toeplitz weight [W*C, sum_i P_i*F_PAD] and bias ----
    # PyTorch Conv1d weight is [F, C_in, K]; flatten to [K*C, F] so rows line
    # up with the char-major / channel-minor flattened input.
    w_cols = []
    for w, ks, p in zip(conv_ws, KERNELS, positions):
        f = w.shape[0]
        w_flat = w.transpose(2, 1, 0).reshape(ks * C, f)      # [ks*C, F]
        w_flat = jnp.pad(w_flat, ((0, 0), (0, F_PAD - f)))    # pad F -> 128
        for t in range(p):
            blk = jnp.zeros((W * C, F_PAD), jnp.float32)
            blk = blk.at[t * C:t * C + ks * C, :].set(w_flat)
            w_cols.append(blk)
    w_all = jnp.concatenate(w_cols, axis=1).astype(jnp.bfloat16)   # [128, 4992]
    b_all = jnp.concatenate(
        [jnp.pad(b.reshape(1, -1), ((0, 0), (0, F_PAD - b.shape[0])))
         for b in conv_bs], axis=1).astype(jnp.float32)            # [1, 384]

    total_cols = w_all.shape[1]
    out_w = n_convs * F_PAD

    kernel = partial(char_conv_kernel, positions=positions, f_pad=F_PAD,
                     chunk_pos=chunk_pos)

    out = pl.pallas_call(
        kernel,
        out_shape=jax.ShapeDtypeStruct((n_pad, out_w), jnp.float32),
        grid_spec=pltpu.PrefetchScalarGridSpec(
            num_scalar_prefetch=0,
            grid=(pl.cdiv(n_pad, tile_n),),
            in_specs=[
                pl.BlockSpec((tile_n, W * C), lambda i: (i, 0)),
                pl.BlockSpec((W * C, total_cols), lambda i: (0, 0)),
                pl.BlockSpec((1, out_w), lambda i: (0, 0)),
            ],
            out_specs=pl.BlockSpec((tile_n, out_w), lambda i: (i, 0)),
        ),
        compiler_params=pltpu.CompilerParams(
            dimension_semantics=("parallel",),
            vmem_limit_bytes=32 * 1024 * 1024),
    )(x_flat, w_all, b_all)

    # Drop padded rows, strip padded filter lanes, restore [B, S, sum(F)].
    out = out[:N].reshape(N, n_convs, F_PAD)
    if len(set(FILTERS)) == 1:
        out = out[:, :, :FILTERS[0]].reshape(N, sum(FILTERS))
    else:
        out = jnp.concatenate(
            [out[:, i, :f] for i, f in enumerate(FILTERS)], axis=-1)
    return out.reshape(B, S, sum(FILTERS))


def ref_forward(x_idx, emb_table, conv_ws, conv_bs):
    """Pure-JAX f32 reference matching the PyTorch forward."""
    emb = jnp.take(emb_table, x_idx, axis=0)
    B, S, W, C = emb.shape
    e = emb.reshape(-1, W, C)
    outs = []
    for w, b, ks in zip(conv_ws, conv_bs, KERNELS):
        pos = []
        for t in range(W - ks + 1):
            win = e[:, t:t + ks, :]                           # [N, ks, C]
            pos.append(jnp.einsum('nkc,fck->nf', win, w) + b)
        outs.append(jnp.max(jnp.stack(pos, axis=-1), axis=-1))
    return jnp.concatenate(outs, axis=-1).reshape(B, S, -1)


if __name__ == "__main__":
    key = jax.random.PRNGKey(0)
    k_emb, k_x, *k_conv = jax.random.split(key, 2 + 2 * len(FILTERS))

    # Deterministic synthetic parameters (shapes from the module __init__).
    emb_table = jax.random.normal(k_emb, (VOCAB, EMBED_DIM), jnp.float32)
    conv_ws, conv_bs = [], []
    for i, (f, ks) in enumerate(zip(FILTERS, KERNELS)):
        conv_ws.append(0.1 * jax.random.normal(
            k_conv[2 * i], (f, EMBED_DIM, ks), jnp.float32))   # [F, C_in, K]
        conv_bs.append(0.1 * jax.random.normal(
            k_conv[2 * i + 1], (f,), jnp.float32))             # [F]

    # Small input consistent with the forward: [B, seq_len, word_len].
    B, S, W = 2, 8, 16
    x_idx = jax.random.randint(k_x, (B, S, W), 0, VOCAB, dtype=jnp.int32)

    out = char_embedding_forward(x_idx, emb_table, conv_ws, conv_bs)
    out = jax.block_until_ready(out)

    ref = ref_forward(x_idx, emb_table, conv_ws, conv_bs)
    assert out.shape == (B, S, sum(FILTERS))
    # bf16 inputs with f32 accumulation: loosened tolerance vs the f32 ref.
    assert jnp.allclose(out, ref, atol=2e-2, rtol=2e-2)

    print("KERNEL_OK")
</pallas_src>

<mosaic_0001>
module attributes {stable_mosaic.version = 11 : i64} {
  func.func @char_conv_kernel(%arg0: i32, %arg1: memref<16x128xbf16, #tpu.memory_space<vmem>>, %arg2: memref<128x4992xbf16, #tpu.memory_space<vmem>>, %arg3: memref<1x384xf32, #tpu.memory_space<vmem>>, %arg4: memref<16x384xf32, #tpu.memory_space<vmem>>) attributes {dimension_semantics = [#tpu.dimension_semantics<parallel>], iteration_bounds = array<i64: 2>, scalar_prefetch = 0 : i64, scratch_operands = 0 : i64, tpu.core_type = #tpu.core_type<tc>, window_params = [{transform_indices = @transform_0, window_bounds = array<i64: 16, 128>}, {pipeline_mode = #tpu.pipeline_mode<synchronous>, transform_indices = @transform_1, window_bounds = array<i64: 128, 4992>}, {pipeline_mode = #tpu.pipeline_mode<synchronous>, transform_indices = @transform_2, window_bounds = array<i64: 1, 384>}, {transform_indices = @transform_3, window_bounds = array<i64: 16, 384>}]} {
    %c0 = arith.constant 0 : index
    %c0_0 = arith.constant 0 : index
    %0 = vector.load %arg1[%c0, %c0_0] : memref<16x128xbf16, #tpu.memory_space<vmem>>, vector<16x128xbf16>
    %c0_1 = arith.constant 0 : index
    %c0_2 = arith.constant 0 : index
    %1 = vector.load %arg2[%c0_1, %c0_2] : memref<128x4992xbf16, #tpu.memory_space<vmem>>, vector<128x512xbf16>
    %cst = arith.constant dense<0.000000e+00> : vector<16x512xf32>
    %2 = tpu.matmul %0, %1, %cst {dimension_numbers = #tpu.dot_dimension_numbers<[1], [0], [0], [1], [0, 0, 1, 1], [], []>} : vector<16x128xbf16>, vector<128x512xbf16>, vector<16x512xf32> -> vector<16x512xf32>
    %3 = vector.extract_strided_slice %2 {offsets = [0, 0], sizes = [16, 128], strides = [1, 1]} : vector<16x512xf32> to vector<16x128xf32>
    %4 = vector.extract_strided_slice %2 {offsets = [0, 128], sizes = [16, 128], strides = [1, 1]} : vector<16x512xf32> to vector<16x128xf32>
    %5 = arith.maximumf %3, %4 : vector<16x128xf32>
    %6 = vector.extract_strided_slice %2 {offsets = [0, 256], sizes = [16, 128], strides = [1, 1]} : vector<16x512xf32> to vector<16x128xf32>
    %7 = arith.maximumf %5, %6 : vector<16x128xf32>
    %8 = vector.extract_strided_slice %2 {offsets = [0, 384], sizes = [16, 128], strides = [1, 1]} : vector<16x512xf32> to vector<16x128xf32>
    %9 = arith.maximumf %7, %8 : vector<16x128xf32>
    %c0_3 = arith.constant 0 : index
    %c512 = arith.constant 512 : index
    %10 = vector.load %arg2[%c0_3, %c512] : memref<128x4992xbf16, #tpu.memory_space<vmem>>, vector<128x512xbf16>
    %cst_4 = arith.constant dense<0.000000e+00> : vector<16x512xf32>
    %11 = tpu.matmul %0, %10, %cst_4 {dimension_numbers = #tpu.dot_dimension_numbers<[1], [0], [0], [1], [0, 0, 1, 1], [], []>} : vector<16x128xbf16>, vector<128x512xbf16>, vector<16x512xf32> -> vector<16x512xf32>
    %12 = vector.extract_strided_slice %11 {offsets = [0, 0], sizes = [16, 128], strides = [1, 1]} : vector<16x512xf32> to vector<16x128xf32>
    %13 = arith.maximumf %9, %12 : vector<16x128xf32>
    %14 = vector.extract_strided_slice %11 {offsets = [0, 128], sizes = [16, 128], strides = [1, 1]} : vector<16x512xf32> to vector<16x128xf32>
    %15 = arith.maximumf %13, %14 : vector<16x128xf32>
    %16 = vector.extract_strided_slice %11 {offsets = [0, 256], sizes = [16, 128], strides = [1, 1]} : vector<16x512xf32> to vector<16x128xf32>
    %17 = arith.maximumf %15, %16 : vector<16x128xf32>
    %18 = vector.extract_strided_slice %11 {offsets = [0, 384], sizes = [16, 128], strides = [1, 1]} : vector<16x512xf32> to vector<16x128xf32>
    %19 = arith.maximumf %17, %18 : vector<16x128xf32>
    %c0_5 = arith.constant 0 : index
    %c1024 = arith.constant 1024 : index
    %20 = vector.load %arg2[%c0_5, %c1024] : memref<128x4992xbf16, #tpu.memory_space<vmem>>, vector<128x512xbf16>
    %cst_6 = arith.constant dense<0.000000e+00> : vector<16x512xf32>
    %21 = tpu.matmul %0, %20, %cst_6 {dimension_numbers = #tpu.dot_dimension_numbers<[1], [0], [0], [1], [0, 0, 1, 1], [], []>} : vector<16x128xbf16>, vector<128x512xbf16>, vector<16x512xf32> -> vector<16x512xf32>
    %22 = vector.extract_strided_slice %21 {offsets = [0, 0], sizes = [16, 128], strides = [1, 1]} : vector<16x512xf32> to vector<16x128xf32>
    %23 = arith.maximumf %19, %22 : vector<16x128xf32>
    %24 = vector.extract_strided_slice %21 {offsets = [0, 128], sizes = [16, 128], strides = [1, 1]} : vector<16x512xf32> to vector<16x128xf32>
    %25 = arith.maximumf %23, %24 : vector<16x128xf32>
    %26 = vector.extract_strided_slice %21 {offsets = [0, 256], sizes = [16, 128], strides = [1, 1]} : vector<16x512xf32> to vector<16x128xf32>
    %27 = arith.maximumf %25, %26 : vector<16x128xf32>
    %28 = vector.extract_strided_slice %21 {offsets = [0, 384], sizes = [16, 128], strides = [1, 1]} : vector<16x512xf32> to vector<16x128xf32>
    %29 = arith.maximumf %27, %28 : vector<16x128xf32>
    %c0_7 = arith.constant 0 : index
    %c1536 = arith.constant 1536 : index
    %30 = vector.load %arg2[%c0_7, %c1536] : memref<128x4992xbf16, #tpu.memory_space<vmem>>, vector<128x256xbf16>
    %cst_8 = arith.constant dense<0.000000e+00> : vector<16x256xf32>
    %31 = tpu.matmul %0, %30, %cst_8 {dimension_numbers = #tpu.dot_dimension_numbers<[1], [0], [0], [1], [0, 0, 1, 1], [], []>} : vector<16x128xbf16>, vector<128x256xbf16>, vector<16x256xf32> -> vector<16x256xf32>
    %32 = vector.extract_strided_slice %31 {offsets = [0, 0], sizes = [16, 128], strides = [1, 1]} : vector<16x256xf32> to vector<16x128xf32>
    %33 = arith.maximumf %29, %32 : vector<16x128xf32>
    %34 = vector.extract_strided_slice %31 {offsets = [0, 128], sizes = [16, 128], strides = [1, 1]} : vector<16x256xf32> to vector<16x128xf32>
    %35 = arith.maximumf %33, %34 : vector<16x128xf32>
    %c0_9 = arith.constant 0 : index
    %c0_10 = arith.constant 0 : index
    %36 = vector.load %arg3[%c0_9, %c0_10] : memref<1x384xf32, #tpu.memory_space<vmem>>, vector<1x128xf32>
    %37 = vector.broadcast %36 : vector<1x128xf32> to vector<16x128xf32>
    %38 = arith.addf %35, %37 : vector<16x128xf32>
    %c0_11 = arith.constant 0 : index
    %c0_12 = arith.constant 0 : index
    %39 = vector.load %arg4[%c0_11, %c0_12] : memref<16x384xf32, #tpu.memory_space<vmem>>, vector<16x128xf32>
    tpu.vector_store %arg4[%c0_11, %c0_12], %38 {strides = array<i32>} : memref<16x384xf32, #tpu.memory_space<vmem>>, vector<16x128xf32>,
    %c0_13 = arith.constant 0 : index
    %c1792 = arith.constant 1792 : index
    %40 = vector.load %arg2[%c0_13, %c1792] : memref<128x4992xbf16, #tpu.memory_space<vmem>>, vector<128x512xbf16>
    %cst_14 = arith.constant dense<0.000000e+00> : vector<16x512xf32>
    %41 = tpu.matmul %0, %40, %cst_14 {dimension_numbers = #tpu.dot_dimension_numbers<[1], [0], [0], [1], [0, 0, 1, 1], [], []>} : vector<16x128xbf16>, vector<128x512xbf16>, vector<16x512xf32> -> vector<16x512xf32>
    %42 = vector.extract_strided_slice %41 {offsets = [0, 0], sizes = [16, 128], strides = [1, 1]} : vector<16x512xf32> to vector<16x128xf32>
    %43 = vector.extract_strided_slice %41 {offsets = [0, 128], sizes = [16, 128], strides = [1, 1]} : vector<16x512xf32> to vector<16x128xf32>
    %44 = arith.maximumf %42, %43 : vector<16x128xf32>
    %45 = vector.extract_strided_slice %41 {offsets = [0, 256], sizes = [16, 128], strides = [1, 1]} : vector<16x512xf32> to vector<16x128xf32>
    %46 = arith.maximumf %44, %45 : vector<16x128xf32>
    %47 = vector.extract_strided_slice %41 {offsets = [0, 384], sizes = [16, 128], strides = [1, 1]} : vector<16x512xf32> to vector<16x128xf32>
    %48 = arith.maximumf %46, %47 : vector<16x128xf32>
    %c0_15 = arith.constant 0 : index
    %c2304 = arith.constant 2304 : index
    %49 = vector.load %arg2[%c0_15, %c2304] : memref<128x4992xbf16, #tpu.memory_space<vmem>>, vector<128x512xbf16>
    %cst_16 = arith.constant dense<0.000000e+00> : vector<16x512xf32>
    %50 = tpu.matmul %0, %49, %cst_16 {dimension_numbers = #tpu.dot_dimension_numbers<[1], [0], [0], [1], [0, 0, 1, 1], [], []>} : vector<16x128xbf16>, vector<128x512xbf16>, vector<16x512xf32> -> vector<16x512xf32>
    %51 = vector.extract_strided_slice %50 {offsets = [0, 0], sizes = [16, 128], strides = [1, 1]} : vector<16x512xf32> to vector<16x128xf32>
    %52 = arith.maximumf %48, %51 : vector<16x128xf32>
    %53 = vector.extract_strided_slice %50 {offsets = [0, 128], sizes = [16, 128], strides = [1, 1]} : vector<16x512xf32> to vector<16x128xf32>
    %54 = arith.maximumf %52, %53 : vector<16x128xf32>
    %55 = vector.extract_strided_slice %50 {offsets = [0, 256], sizes = [16, 128], strides = [1, 1]} : vector<16x512xf32> to vector<16x128xf32>
    %56 = arith.maximumf %54, %55 : vector<16x128xf32>
    %57 = vector.extract_strided_slice %50 {offsets = [0, 384], sizes = [16, 128], strides = [1, 1]} : vector<16x512xf32> to vector<16x128xf32>
    %58 = arith.maximumf %56, %57 : vector<16x128xf32>
    %c0_17 = arith.constant 0 : index
    %c2816 = arith.constant 2816 : index
    %59 = vector.load %arg2[%c0_17, %c2816] : memref<128x4992xbf16, #tpu.memory_space<vmem>>, vector<128x512xbf16>
    %cst_18 = arith.constant dense<0.000000e+00> : vector<16x512xf32>
    %60 = tpu.matmul %0, %59, %cst_18 {dimension_numbers = #tpu.dot_dimension_numbers<[1], [0], [0], [1], [0, 0, 1, 1], [], []>} : vector<16x128xbf16>, vector<128x512xbf16>, vector<16x512xf32> -> vector<16x512xf32>
    %61 = vector.extract_strided_slice %60 {offsets = [0, 0], sizes = [16, 128], strides = [1, 1]} : vector<16x512xf32> to vector<16x128xf32>
    %62 = arith.maximumf %58, %61 : vector<16x128xf32>
    %63 = vector.extract_strided_slice %60 {offsets = [0, 128], sizes = [16, 128], strides = [1, 1]} : vector<16x512xf32> to vector<16x128xf32>
    %64 = arith.maximumf %62, %63 : vector<16x128xf32>
    %65 = vector.extract_strided_slice %60 {offsets = [0, 256], sizes = [16, 128], strides = [1, 1]} : vector<16x512xf32> to vector<16x128xf32>
    %66 = arith.maximumf %64, %65 : vector<16x128xf32>
    %67 = vector.extract_strided_slice %60 {offsets = [0, 384], sizes = [16, 128], strides = [1, 1]} : vector<16x512xf32> to vector<16x128xf32>
    %68 = arith.maximumf %66, %67 : vector<16x128xf32>
    %c0_19 = arith.constant 0 : index
    %c3328 = arith.constant 3328 : index
    %69 = vector.load %arg2[%c0_19, %c3328] : memref<128x4992xbf16, #tpu.memory_space<vmem>>, vector<128x128xbf16>
    %cst_20 = arith.constant dense<0.000000e+00> : vector<16x128xf32>
    %70 = tpu.matmul %0, %69, %cst_20 {dimension_numbers = #tpu.dot_dimension_numbers<[1], [0], [0], [1], [0, 0, 1, 1], [], []>} : vector<16x128xbf16>, vector<128x128xbf16>, vector<16x128xf32> -> vector<16x128xf32>
    %71 = arith.maximumf %68, %70 : vector<16x128xf32>
    %c0_21 = arith.constant 0 : index
    %c128 = arith.constant 128 : index
    %72 = vector.load %arg3[%c0_21, %c128] : memref<1x384xf32, #tpu.memory_space<vmem>>, vector<1x128xf32>
    %73 = vector.broadcast %72 : vector<1x128xf32> to vector<16x128xf32>
    %74 = arith.addf %71, %73 : vector<16x128xf32>
    %c0_22 = arith.constant 0 : index
    %c128_23 = arith.constant 128 : index
    %75 = vector.load %arg4[%c0_22, %c128_23] : memref<16x384xf32, #tpu.memory_space<vmem>>, vector<16x128xf32>
    tpu.vector_store %arg4[%c0_22, %c128_23], %74 {strides = array<i32>} : memref<16x384xf32, #tpu.memory_space<vmem>>, vector<16x128xf32>,
    %c0_24 = arith.constant 0 : index
    %c3456 = arith.constant 3456 : index
    %76 = vector.load %arg2[%c0_24, %c3456] : memref<128x4992xbf16, #tpu.memory_space<vmem>>, vector<128x512xbf16>
    %cst_25 = arith.constant dense<0.000000e+00> : vector<16x512xf32>
    %77 = tpu.matmul %0, %76, %cst_25 {dimension_numbers = #tpu.dot_dimension_numbers<[1], [0], [0], [1], [0, 0, 1, 1], [], []>} : vector<16x128xbf16>, vector<128x512xbf16>, vector<16x512xf32> -> vector<16x512xf32>
    %78 = vector.extract_strided_slice %77 {offsets = [0, 0], sizes = [16, 128], strides = [1, 1]} : vector<16x512xf32> to vector<16x128xf32>
    %79 = vector.extract_strided_slice %77 {offsets = [0, 128], sizes = [16, 128], strides = [1, 1]} : vector<16x512xf32> to vector<16x128xf32>
    %80 = arith.maximumf %78, %79 : vector<16x128xf32>
    %81 = vector.extract_strided_slice %77 {offsets = [0, 256], sizes = [16, 128], strides = [1, 1]} : vector<16x512xf32> to vector<16x128xf32>
    %82 = arith.maximumf %80, %81 : vector<16x128xf32>
    %83 = vector.extract_strided_slice %77 {offsets = [0, 384], sizes = [16, 128], strides = [1, 1]} : vector<16x512xf32> to vector<16x128xf32>
    %84 = arith.maximumf %82, %83 : vector<16x128xf32>
    %c0_26 = arith.constant 0 : index
    %c3968 = arith.constant 3968 : index
    %85 = vector.load %arg2[%c0_26, %c3968] : memref<128x4992xbf16, #tpu.memory_space<vmem>>, vector<128x512xbf16>
    %cst_27 = arith.constant dense<0.000000e+00> : vector<16x512xf32>
    %86 = tpu.matmul %0, %85, %cst_27 {dimension_numbers = #tpu.dot_dimension_numbers<[1], [0], [0], [1], [0, 0, 1, 1], [], []>} : vector<16x128xbf16>, vector<128x512xbf16>, vector<16x512xf32> -> vector<16x512xf32>
    %87 = vector.extract_strided_slice %86 {offsets = [0, 0], sizes = [16, 128], strides = [1, 1]} : vector<16x512xf32> to vector<16x128xf32>
    %88 = arith.maximumf %84, %87 : vector<16x128xf32>
    %89 = vector.extract_strided_slice %86 {offsets = [0, 128], sizes = [16, 128], strides = [1, 1]} : vector<16x512xf32> to vector<16x128xf32>
    %90 = arith.maximumf %88, %89 : vector<16x128xf32>
    %91 = vector.extract_strided_slice %86 {offsets = [0, 256], sizes = [16, 128], strides = [1, 1]} : vector<16x512xf32> to vector<16x128xf32>
    %92 = arith.maximumf %90, %91 : vector<16x128xf32>
    %93 = vector.extract_strided_slice %86 {offsets = [0, 384], sizes = [16, 128], strides = [1, 1]} : vector<16x512xf32> to vector<16x128xf32>
    %94 = arith.maximumf %92, %93 : vector<16x128xf32>
    %c0_28 = arith.constant 0 : index
    %c4480 = arith.constant 4480 : index
    %95 = vector.load %arg2[%c0_28, %c4480] : memref<128x4992xbf16, #tpu.memory_space<vmem>>, vector<128x512xbf16>
    %cst_29 = arith.constant dense<0.000000e+00> : vector<16x512xf32>
    %96 = tpu.matmul %0, %95, %cst_29 {dimension_numbers = #tpu.dot_dimension_numbers<[1], [0], [0], [1], [0, 0, 1, 1], [], []>} : vector<16x128xbf16>, vector<128x512xbf16>, vector<16x512xf32> -> vector<16x512xf32>
    %97 = vector.extract_strided_slice %96 {offsets = [0, 0], sizes = [16, 128], strides = [1, 1]} : vector<16x512xf32> to vector<16x128xf32>
    %98 = arith.maximumf %94, %97 : vector<16x128xf32>
    %99 = vector.extract_strided_slice %96 {offsets = [0, 128], sizes = [16, 128], strides = [1, 1]} : vector<16x512xf32> to vector<16x128xf32>
    %100 = arith.maximumf %98, %99 : vector<16x128xf32>
    %101 = vector.extract_strided_slice %96 {offsets = [0, 256], sizes = [16, 128], strides = [1, 1]} : vector<16x512xf32> to vector<16x128xf32>
    %102 = arith.maximumf %100, %101 : vector<16x128xf32>
    %103 = vector.extract_strided_slice %96 {offsets = [0, 384], sizes = [16, 128], strides = [1, 1]} : vector<16x512xf32> to vector<16x128xf32>
    %104 = arith.maximumf %102, %103 : vector<16x128xf32>
    %c0_30 = arith.constant 0 : index
    %c256 = arith.constant 256 : index
    %105 = vector.load %arg3[%c0_30, %c256] : memref<1x384xf32, #tpu.memory_space<vmem>>, vector<1x128xf32>
    %106 = vector.broadcast %105 : vector<1x128xf32> to vector<16x128xf32>
    %107 = arith.addf %104, %106 : vector<16x128xf32>
    %c0_31 = arith.constant 0 : index
    %c256_32 = arith.constant 256 : index
    %108 = vector.load %arg4[%c0_31, %c256_32] : memref<16x384xf32, #tpu.memory_space<vmem>>, vector<16x128xf32>
    tpu.vector_store %arg4[%c0_31, %c256_32], %107 {strides = array<i32>} : memref<16x384xf32, #tpu.memory_space<vmem>>, vector<16x128xf32>,
    return
  }
  func.func @transform_0(%arg0: i32) -> (i32, i32) {
    %c0_i32 = arith.constant 0 : i32
    %c0_i32_0 = arith.constant 0 : i32
    return %arg0, %c0_i32 : i32, i32
  }
  func.func @transform_1(%arg0: i32) -> (i32, i32) {
    %c0_i32 = arith.constant 0 : i32
    %c0_i32_0 = arith.constant 0 : i32
    %c0_i32_1 = arith.constant 0 : i32
    return %c0_i32, %c0_i32_0 : i32, i32
  }
  func.func @transform_2(%arg0: i32) -> (i32, i32) {
    %c0_i32 = arith.constant 0 : i32
    %c0_i32_0 = arith.constant 0 : i32
    %c0_i32_1 = arith.constant 0 : i32
    return %c0_i32, %c0_i32_0 : i32, i32
  }
  func.func @transform_3(%arg0: i32) -> (i32, i32) {
    %c0_i32 = arith.constant 0 : i32
    %c0_i32_0 = arith.constant 0 : i32
    return %arg0, %c0_i32 : i32, i32
  }
}

</mosaic_0001>

<bundles_post_ra>
// kernel: tpu_custom_call.1
= control target key start
LH: loop header
LB: loop body
LE: loop exit
PB: predicated region body
PF: predicated region fallthrough
CT: control target
= control target key end

     0   :  { %8 = vsyncpa [#allocation3], 0  ;;  %s4605_s0 = inlined_call_operand.hbm [shape: bf16[32,128], index: 0, kind: input, shape index: {}]   ;;  %s4606_s1 = inlined_call_operand.hbm [shape: bf16[128,4992], index: 1, kind: input, shape index: {}]   ;;  %s4607_s2 = inlined_call_operand.hbm [shape: f32[1,384], index: 2, kind: input, shape index: {}]   ;;  %s4608_s3 = inlined_call_operand.hbm [shape: f32[32,384], index: 3, kind: output, shape index: {}]  }
   0x1   :  { %10 = vsyncpa [#allocation3 + $0x1], 0 }
   0x2   :  { %11 = vsyncpa [#allocation6], 0 }
   0x3   :  { %12 = vsyncpa [#allocation4], 0 }
   0x4   :  { %14 = vsyncpa [#allocation4 + $0x1], 0  ;;  %s4283_s12 = smov 0   ;;  %s4285_s13 = smov 0  }
   0x5   :  { %s4287_s14 = smov 0   ;;  %s4289_s15 = smov 0  }
   0x6 LB: > { %s4304_s16 = sadd.s32 4294967295, %s4248_s15   ;;  %s3185_s17 = sadd.s32 4294967294, %s4248_s15   ;;  %s4248_s15 = sphi %s4289_s15, %s4628_s15   ;;  %s4244_s14 = sphi %s4287_s14, %s4627_s14   ;;  %s4240_s13 = sphi %s4285_s13, %s4626_s13   ;;  %s4236_s12 = sphi %s4283_s12, %s4625_s12  }
   0x7   : > { %p40_p0 = scmp.ne.s32.totalorder %s4240_s13, %s4236_s12  ;;  %p4609_p1 = scmp.eq.s32.totalorder %s4304_s16, 0 }
   0x8   : > { %p112_p3 = scmp.eq.s32.totalorder %s3185_s17, 1  ;;  %p3186_p5 = scmp.ge.s32.totalorder %s4248_s15, 1 }
   0x9   : > { %p4313_p4 = por %p4609_p1, %p40_p0  ;;  %p119_p7 = scmp.lt.s32.totalorder %s4248_s15, 3 }
   0xa   : > { %p4318_p6 = por %p112_p3, %p40_p0  ;;  %s4250_s21 = smov [#allocation5]  }
   0xb   : > { %s4612_s18 = scalar_select %p4313_p4, 1, 0 }
   0xc   : > { %s4613_s19 = scalar_select %p4318_p6, 1, 0 }
   0xd   : > { %p4323_p8 = pnand %p3186_p5, %p119_p7  ;;  %s131_s22 = sshll.u32 %s4250_s21, 4  ;;  %s4327_s22 = int_to_ptr.vmem [resolvable:$true] %s131_s22 }
   0xe   : > { %s4251_s24 = smov [#allocation7]   ;;  %s4092_s28 = scalar_lea.hbm %s4606_s1, 39936 }
   0xf   : > { %p3562_p9 = pneg %p4323_p8  ;;  %s145_s25 = sshll.u32 %s4251_s24, 4  ;;  %s4338_s25 = int_to_ptr.vmem [resolvable:$true] %s145_s25 }
  0x10   : > { %p4093_p12 = scmp.ne.s32.totalorder %s4606_s1, %s4092_s28  ;;  %p4099_p5 = scmp.lt.u32.totalorder %s4092_s28, %s4606_s1 }
  0x11   : > { %p4334_p11 = pnand %p3562_p9, %p4609_p1 }
  0x13   : > { %p4094_p13 = pneg %p4334_p11 }
  0x15   : > { %p4095_p0 = pnand %p4094_p13, %p4093_p12 }
  0x17   : > { %p4096_p3 = pneg %p4095_p0 }
  0x19   : > { %p4101_p7 = pnand %p4099_p5, %p4096_p3 }
  0x1b   : > { %4104 = shalt.err (!%p4101_p7)
}
  0x1c   : > { %s4105_s6 = scalar_lea.vmem %s4327_s22, 39936  ;;  %p4113_p2 = scmp.lt.s32.totalorder %s4327_s22, %s4327_s22 }
  0x1d   : > { %p4106_p9 = scmp.ne.s32.totalorder %s4327_s22, %s4105_s6  ;;  %p4114_p12 = scmp.lt.s32.totalorder %s4105_s6, %s4105_s6 }
  0x1f   : > { %p4108_p10 = pnand %p4106_p9, %p4094_p13  ;;  %p4115_p0 = por %p4114_p12, %p4113_p2 }
  0x21   : > { %p4109_p1 = pneg %p4108_p10 }
  0x23   : > { %p4116_p6 = pnand %p4115_p0, %p4109_p1 }
  0x25   : > { %4119 = shalt.err (!%p4116_p6)
}
  0x26   : > { %s4252_s7 = smov 2496   ;;  %s4253_s8 = smov 156  }
  0x27   : > { %3565 = dma.hbm_to_vmem [thread:$0]  (!%p4334_p11), %s4606_s1, 39936, %s4327_s22, [#allocation6], %s4252_s7, %s4252_s7, %s4253_s8  }
  0x28   : > { %s4120_s21 = scalar_lea.hbm %s4607_s2, 48 }
  0x29   : > { %p4121_p2 = scmp.ne.s32.totalorder %s4607_s2, %s4120_s21  ;;  %p4127_p10 = scmp.lt.u32.totalorder %s4120_s21, %s4607_s2 }
  0x2b   : > { %p4123_p1 = pnand %p4121_p2, %p4094_p13 }
  0x2d   : > { %p4124_p6 = pneg %p4123_p1 }
  0x2f   : > { %p4129_p3 = pnand %p4127_p10, %p4124_p6 }
  0x31   : > { %4132 = shalt.err (!%p4129_p3)
}
  0x32   : > { %s4133_s22 = scalar_lea.vmem %s4338_s25, 48  ;;  %s4140_s29 = scalar_lea.vmem %s4338_s25, 64 }
  0x33   : > { %p4134_p5 = scmp.ne.s32.totalorder %s4338_s25, %s4133_s22  ;;  %p4141_p12 = scmp.lt.s32.totalorder %s4338_s25, %s4338_s25 }
  0x34   : > { %p4142_p0 = scmp.lt.s32.totalorder %s4140_s29, %s4133_s22 }
  0x35   : > { %p4136_p7 = pnand %p4134_p5, %p4094_p13 }
  0x36   : > { %p4143_p2 = por %p4142_p0, %p4141_p12 }
  0x37   : > { %p4137_p9 = pneg %p4136_p7 }
  0x39   : > { %p4144_p1 = pnand %p4143_p2, %p4137_p9 }
  0x3b   : > { %4147 = shalt.err (!%p4144_p1)
}
  0x3c   : > { %3568 = dma.hbm_to_vmem [thread:$0]  (!%p4334_p11), %s4607_s2, 48, %s4338_s25, [#allocation6]  }
  0x3d   : > { %s4394_s5 = sadd.s32 1, %s4248_s15   ;;  %s27_s23 = sadd.s32 1, %s4244_s14 }
  0x3e   : > { %s24_s6 = ssub.s32 %s4248_s15, %s4394_s5  ;;  %p34_p13 = scmp.ne.s32.totalorder %s4244_s14, %s4240_s13 }
  0x3f   : > { %p25_p6 = scmp.eq.s32.totalorder %s24_s6, 0  ;;  %p35_p10 = scmp.eq.s32.totalorder %s4248_s15, 0 }
  0x40   : > { %p4616_p3 = scmp.eq.s32.totalorder %s4304_s16, 1  ;;  %p3579_p7 = scmp.lt.s32.totalorder %s4248_s15, 2 }
  0x41   : > { %s4410_s8 = scalar_select %p25_p6, %s4244_s14, %s27_s23  }
  0x42   : > { %p4404_p5 = por %p4616_p3, %p34_p13  ;;  %p36_p9 = por %p35_p10, %p34_p13 }
  0x43   : > { %s156_s9 = sand.u32 1, %s4244_s14   ;;  %s3518_s25 = sshll.u32 %s4248_s15, 7 }
  0x44   : > { %s4617_s7 = scalar_select %p4404_p5, 1, 0 }
  0x45   : > { %s3190_s10 = sshll.u32 %s156_s9, 3  ;;  %s4417_s21 = scalar_lea.hbm %s4605_s0, %s3518_s25 }
  0x46   : > { %s160_s24 = scalar_lea.vmem [#allocation2], %s3190_s10  ;;  %p4421_p11 = pnand %p3579_p7, %p36_p9 }
  0x47   : > { %s167_s26 = sshll.u32 %s160_s24, 4  ;;  %s4425_s28 = scalar_lea.sflag [#allocation3], %s156_s9  ;;  %s4419_s26 = int_to_ptr.vmem [resolvable:$true] %s167_s26 }
  0x48   : > { %s4148_s22 = scalar_lea.hbm %s4417_s21, 128  ;;  %p4150_p0 = pneg %p4421_p11 }
  0x49   : > { %p4149_p12 = scmp.ne.s32.totalorder %s4417_s21, %s4148_s22  ;;  %s4153_s4 = scalar_lea.hbm %s4605_s0, 256 }
  0x4a   : > { %p4154_p13 = scmp.lt.u32.totalorder %s4417_s21, %s4605_s0  ;;  %p4155_p6 = scmp.lt.u32.totalorder %s4153_s4, %s4148_s22 }
  0x4b   : > { %p4151_p2 = pnand %p4150_p0, %p4149_p12  ;;  %p4157_p3 = scmp.lt.u32.totalorder %s4148_s22, %s4417_s21 }
  0x4c   : > { %p4156_p10 = por %p4155_p6, %p4154_p13 }
  0x4d   : > { %p4152_p1 = pneg %p4151_p2 }
  0x4e   : > { %p4158_p7 = por %p4157_p3, %p4156_p10 }
  0x50   : > { %p4159_p9 = pnand %p4158_p7, %p4152_p1 }
  0x52   : > { %4162 = shalt.err (!%p4159_p9)
}
  0x53   : > { %s4163_s9 = scalar_lea.vmem %s4419_s26, 128  ;;  %s4254_s10 = smov [#allocation2]  }
  0x54   : > { %p4164_p12 = scmp.ne.s32.totalorder %s4419_s26, %s4163_s9  ;;  %s4168_s25 = sshll.u32 %s4254_s10, 4  ;;  %s4169_s25 = int_to_ptr.vmem [resolvable:$false] %s4168_s25 }
  0x55   : > { %s4170_s11 = scalar_lea.vmem %s4169_s25, 256  ;;  %p4171_p4 = scmp.lt.s32.totalorder %s4419_s26, %s4169_s25 }
  0x56   : > { %p4166_p2 = pnand %p4164_p12, %p4150_p0  ;;  %p4172_p13 = scmp.lt.s32.totalorder %s4170_s11, %s4163_s9 }
  0x58   : > { %p4167_p5 = pneg %p4166_p2  ;;  %p4173_p6 = por %p4172_p13, %p4171_p4 }
  0x5a   : > { %p4174_p10 = pnand %p4173_p6, %p4167_p5 }
  0x5c   : > { %4177 = shalt.err (!%p4174_p10)
}
  0x5d   : > { %s4255_s17 = smov 64   ;;  %s4256_s24 = smov 4  }
  0x5e   : > { %3572 = dma.hbm_to_vmem [thread:$0]  (!%p4421_p11), %s4417_s21, 128, %s4419_s26, %s4425_s28, %s4255_s17, %s4255_s17, %s4256_s24  }
  0x5f   : > { %179 = sbr.rel (%p4323_p8) target bundleno = 667 (0x29b), region = 32  ;;  %s4456_s22 = sand.u32 (!%p4323_p8), 1, %s4240_s13  }
  0x60   : > { %s3194_s29 = sshll.u32 (!%p4323_p8), %s4456_s22, 3  ;;  %s182_s30 = scalar_lea.sflag (!%p4323_p8), [#allocation3], %s4456_s22 }
  0x61   : > { %s4460_s4 = scalar_lea.vmem (!%p4323_p8), [#allocation2], %s3194_s29  ;;  %p4619_p4 = scmp.ne.s32.totalorder (!%p4323_p8), %s4612_s18, 0 }
  0x66   : > { %4223 = dma.done.wait (%p4619_p4), %s182_s30, 128  }
  0x67   : > { %4225 = vsyncadd (%p4619_p4), %s182_s30, 4294967168  ;;  %p4620_p5 = scmp.eq.s32.totalorder %s4304_s16, 0 }
  0x69   : > { %4227 = dma.done.wait (%p4620_p5), [#allocation6], 39984   ;;  %p4621_p8 = pmov %p4620_p5 }
  0x6a   : > { %v4257_v0 = vmov 0   ;;  %v3626_v1 = vld [vmem:[#allocation5 + $0x4] ss:$156 sps:$4 sm:$0xff]   ;;  %v3629_v3 = vld [vmem:[#allocation5 + $0xc] ss:$156 sps:$4 sm:$0xff]   ;;  %v4473_v34 = vld [vmem:[%s4460_s4] sm:$0xff]  }
  0x6b   : > { %4229 = vsyncadd (%p4621_p8), [#allocation6], 4294927312  ;;  %451 = vmatprep.mubr.bf16.mxu0 %v4257_v0  ;;  %494 = vmatprep.mubr.bf16.mxu1 %v4257_v0  ;;  %v3628_v2 = vld [vmem:[#allocation5] ss:$156 sps:$4 sm:$0xff]   ;;  %v3631_v4 = vld [vmem:[#allocation5 + $0x8] ss:$156 sps:$4 sm:$0xff]  }
  0x6c   : > { %419 = vmatprep.subr.bf16.mxu0 %v3626_v1  ;;  %v3632_v5 = vld [vmem:[#allocation5 + $0x13c] ss:$156 sps:$4 sm:$0xff]   ;;  %462 = vmatprep.subr.bf16.mxu1 %v3629_v3  ;;  %v3635_v7 = vld [vmem:[#allocation5 + $0x144] ss:$156 sps:$4 sm:$0xff]   ;;  %v3638_v9 = vld [vmem:[#allocation5 + $0x274] ss:$156 sps:$4 sm:$0xff]  }
  0x6d   : > { %420 = vmatpush1.bf16.msra.mxu0 %v3628_v2  ;;  %v3634_v6 = vld [vmem:[#allocation5 + $0x138] ss:$156 sps:$4 sm:$0xff]   ;;  %463 = vmatpush1.bf16.msra.mxu1 %v3631_v4  ;;  %v3637_v8 = vld [vmem:[#allocation5 + $0x140] ss:$156 sps:$4 sm:$0xff]   ;;  %v3640_v10 = vld [vmem:[#allocation5 + $0x270] ss:$156 sps:$4 sm:$0xff]  }
  0x6e   : > { %421 = vmatprep.subr.bf16.mxu0 %v3632_v5  ;;  %464 = vmatprep.subr.bf16.mxu1 %v3635_v7  ;;  %v3641_v11 = vld [vmem:[#allocation5 + $0x27c] ss:$156 sps:$4 sm:$0xff]   ;;  %v3644_v12 = vld [vmem:[#allocation5 + $0x3ac] ss:$156 sps:$4 sm:$0xff]   ;;  %v3647_v14 = vld [vmem:[#allocation5 + $0x3b4] ss:$156 sps:$4 sm:$0xff]  }
  0x6f   : > { %v3643_v13 = vld [vmem:[#allocation5 + $0x278] ss:$156 sps:$4 sm:$0xff]   ;;  %v3646_v15 = vld [vmem:[#allocation5 + $0x3a8] ss:$156 sps:$4 sm:$0xff]   ;;  %v3649_v17 = vld [vmem:[#allocation5 + $0x3b0] ss:$156 sps:$4 sm:$0xff]  }
  0x70   : > { %v3650_v16 = vld [vmem:[#allocation5 + $0x4e4] ss:$156 sps:$4 sm:$0xff]   ;;  %v3653_v18 = vld [vmem:[#allocation5 + $0x4ec] ss:$156 sps:$4 sm:$0xff]   ;;  %v3656_v20 = vld [vmem:[#allocation5 + $0x61c] ss:$156 sps:$4 sm:$0xff]  }
  0x71   : > { %422 = vmatpush1.bf16.msra.mxu0 %v3634_v6  ;;  %465 = vmatpush1.bf16.msra.mxu1 %v3637_v8  ;;  %v3652_v19 = vld [vmem:[#allocation5 + $0x4e0] ss:$156 sps:$4 sm:$0xff]   ;;  %v3655_v21 = vld [vmem:[#allocation5 + $0x4e8] ss:$156 sps:$4 sm:$0xff]   ;;  %v3658_v23 = vld [vmem:[#allocation5 + $0x618] ss:$156 sps:$4 sm:$0xff]  }
  0x72   : > { %423 = vmatprep.subr.bf16.mxu0 %v3638_v9  ;;  %466 = vmatprep.subr.bf16.mxu1 %v3641_v11  ;;  %v3659_v22 = vld [vmem:[#allocation5 + $0x624] ss:$156 sps:$4 sm:$0xff]   ;;  %v3662_v24 = vld [vmem:[#allocation5 + $0x754] ss:$156 sps:$4 sm:$0xff]   ;;  %v3665_v26 = vld [vmem:[#allocation5 + $0x75c] ss:$156 sps:$4 sm:$0xff]  }
  0x73   : > { %v3661_v25 = vld [vmem:[#allocation5 + $0x620] ss:$156 sps:$4 sm:$0xff]   ;;  %v3664_v27 = vld [vmem:[#allocation5 + $0x750] ss:$156 sps:$4 sm:$0xff]   ;;  %v3667_v29 = vld [vmem:[#allocation5 + $0x758] ss:$156 sps:$4 sm:$0xff]  }
  0x74   : > { %v3668_v28 = vld [vmem:[#allocation5 + $0x88c] ss:$156 sps:$4 sm:$0xff]   ;;  %v3671_v30 = vld [vmem:[#allocation5 + $0x894] ss:$156 sps:$4 sm:$0xff]   ;;  %v3680_v35 = vld [vmem:[#allocation5 + $0x1c] ss:$156 sps:$4 sm:$0xff]  }
  0x75   : > { %424 = vmatpush1.bf16.msra.mxu0 %v3640_v10  ;;  %467 = vmatpush1.bf16.msra.mxu1 %v3643_v13  ;;  %v3670_v31 = vld [vmem:[#allocation5 + $0x888] ss:$156 sps:$4 sm:$0xff]   ;;  %v3673_v32 = vld [vmem:[#allocation5 + $0x890] ss:$156 sps:$4 sm:$0xff]   ;;  %v3678_v38 = vld [vmem:[#allocation5 + $0x18] ss:$156 sps:$4 sm:$0xff]  }
  0x76   : > { %425 = vmatprep.subr.bf16.mxu0 %v3644_v12  ;;  %468 = vmatprep.subr.bf16.mxu1 %v3647_v14  ;;  %v3677_v33 = vld [vmem:[#allocation5 + $0x14] ss:$156 sps:$4 sm:$0xff]   ;;  %v3683_v37 = vld [vmem:[#allocation5 + $0x14c] ss:$156 sps:$4 sm:$0xff]   ;;  %v3689_v41 = vld [vmem:[#allocation5 + $0x284] ss:$156 sps:$4 sm:$0xff]  }
  0x77   : > { %v3675_v36 = vld [vmem:[#allocation5 + $0x10] ss:$156 sps:$4 sm:$0xff]   ;;  %v3681_v40 = vld [vmem:[#allocation5 + $0x148] ss:$156 sps:$4 sm:$0xff]   ;;  %v3687_v44 = vld [vmem:[#allocation5 + $0x280] ss:$156 sps:$4 sm:$0xff]  }
  0x78   : > { %v3686_v39 = vld [vmem:[#allocation5 + $0x154] ss:$156 sps:$4 sm:$0xff]   ;;  %v3692_v43 = vld [vmem:[#allocation5 + $0x28c] ss:$156 sps:$4 sm:$0xff]   ;;  %v3695_v45 = vld [vmem:[#allocation5 + $0x3bc] ss:$156 sps:$4 sm:$0xff]  }
  0x79   : > { %426 = vmatpush1.bf16.msra.mxu0 %v3646_v15  ;;  %469 = vmatpush1.bf16.msra.mxu1 %v3649_v17  ;;  %v3684_v42 = vld [vmem:[#allocation5 + $0x150] ss:$156 sps:$4 sm:$0xff]   ;;  %v3690_v46 = vld [vmem:[#allocation5 + $0x288] ss:$156 sps:$4 sm:$0xff]   ;;  %v3693_v48 = vld [vmem:[#allocation5 + $0x3b8] ss:$156 sps:$4 sm:$0xff]  }
  0x7a   : > { %427 = vmatprep.subr.bf16.mxu0 %v3650_v16  ;;  %470 = vmatprep.subr.bf16.mxu1 %v3653_v18  ;;  %v3698_v47 = vld [vmem:[#allocation5 + $0x3c4] ss:$156 sps:$4 sm:$0xff]   ;;  %v3701_v49 = vld [vmem:[#allocation5 + $0x4f4] ss:$156 sps:$4 sm:$0xff]   ;;  %v3704_v51 = vld [vmem:[#allocation5 + $0x4fc] ss:$156 sps:$4 sm:$0xff]  }
  0x7b   : > { %v3696_v50 = vld [vmem:[#allocation5 + $0x3c0] ss:$156 sps:$4 sm:$0xff]   ;;  %v3699_v52 = vld [vmem:[#allocation5 + $0x4f0] ss:$156 sps:$4 sm:$0xff]   ;;  %v3702_v54 = vld [vmem:[#allocation5 + $0x4f8] ss:$156 sps:$4 sm:$0xff]  }
  0x7c   : > { %v3707_v53 = vld [vmem:[#allocation5 + $0x62c] ss:$156 sps:$4 sm:$0xff]   ;;  %v3710_v55 = vld [vmem:[#allocation5 + $0x634] ss:$156 sps:$4 sm:$0xff]   ;;  %v3713_v57 = vld [vmem:[#allocation5 + $0x764] ss:$156 sps:$4 sm:$0xff]  }
  0x7d   : > { %428 = vmatpush1.bf16.msra.mxu0 %v3652_v19  ;;  %471 = vmatpush1.bf16.msra.mxu1 %v3655_v21  ;;  %v3705_v56 = vld [vmem:[#allocation5 + $0x628] ss:$156 sps:$4 sm:$0xff]   ;;  %v3708_v58 = vld [vmem:[#allocation5 + $0x630] ss:$156 sps:$4 sm:$0xff]   ;;  %v3711_v60 = vld [vmem:[#allocation5 + $0x760] ss:$156 sps:$4 sm:$0xff]  }
  0x7e   : > { %429 = vmatprep.subr.bf16.mxu0 %v3656_v20  ;;  %472 = vmatprep.subr.bf16.mxu1 %v3659_v22  ;;  %v3716_v59 = vld [vmem:[#allocation5 + $0x76c] ss:$156 sps:$4 sm:$0xff]   ;;  %v3719_v61 = vld [vmem:[#allocation5 + $0x89c] ss:$156 sps:$4 sm:$0xff]   ;;  %v3722_v63 = vld [vmem:[#allocation5 + $0x8a4] ss:$156 sps:$4 sm:$0xff]  }
  0x7f   : > { %v3714_v62 = vld [vmem:[#allocation5 + $0x768] ss:$156 sps:$4 sm:$0xff]   ;;  %v3717_v1 = vld [vmem:[#allocation5 + $0x898] ss:$156 sps:$4 sm:$0xff]   ;;  %v3720_v3 = vld [vmem:[#allocation5 + $0x8a0] ss:$156 sps:$4 sm:$0xff]  }
  0x80   : > { %v3725_v2 = vld [vmem:[#allocation5 + $0x24] ss:$156 sps:$4 sm:$0xff]   ;;  %v3728_v4 = vld [vmem:[#allocation5 + $0x2c] ss:$156 sps:$4 sm:$0xff]   ;;  %v3731_v6 = vld [vmem:[#allocation5 + $0x15c] ss:$156 sps:$4 sm:$0xff]  }
  0x81   : > { %430 = vmatpush1.bf16.msra.mxu0 %v3658_v23  ;;  %473 = vmatpush1.bf16.msra.mxu1 %v3661_v25  ;;  %v3723_v5 = vld [vmem:[#allocation5 + $0x20] ss:$156 sps:$4 sm:$0xff]   ;;  %v3726_v7 = vld [vmem:[#allocation5 + $0x28] ss:$156 sps:$4 sm:$0xff]   ;;  %v3729_v9 = vld [vmem:[#allocation5 + $0x158] ss:$156 sps:$4 sm:$0xff]  }
  0x82   : > { %431 = vmatprep.subr.bf16.mxu0 %v3662_v24  ;;  %474 = vmatprep.subr.bf16.mxu1 %v3665_v26  ;;  %v3734_v8 = vld [vmem:[#allocation5 + $0x164] ss:$156 sps:$4 sm:$0xff]   ;;  %v3737_v10 = vld [vmem:[#allocation5 + $0x294] ss:$156 sps:$4 sm:$0xff]   ;;  %v3740_v12 = vld [vmem:[#allocation5 + $0x29c] ss:$156 sps:$4 sm:$0xff]  }
  0x83   : > { %v3732_v11 = vld [vmem:[#allocation5 + $0x160] ss:$156 sps:$4 sm:$0xff]   ;;  %v3735_v13 = vld [vmem:[#allocation5 + $0x290] ss:$156 sps:$4 sm:$0xff]   ;;  %v3738_v15 = vld [vmem:[#allocation5 + $0x298] ss:$156 sps:$4 sm:$0xff]  }
  0x84   : > { %v3743_v14 = vld [vmem:[#allocation5 + $0x3cc] ss:$156 sps:$4 sm:$0xff]   ;;  %v3746_v16 = vld [vmem:[#allocation5 + $0x3d4] ss:$156 sps:$4 sm:$0xff]   ;;  %v3749_v18 = vld [vmem:[#allocation5 + $0x504] ss:$156 sps:$4 sm:$0xff]  }
  0x85   : > { %432 = vmatpush1.bf16.msra.mxu0 %v3664_v27  ;;  %475 = vmatpush1.bf16.msra.mxu1 %v3667_v29  ;;  %v3741_v17 = vld [vmem:[#allocation5 + $0x3c8] ss:$156 sps:$4 sm:$0xff]   ;;  %v3744_v19 = vld [vmem:[#allocation5 + $0x3d0] ss:$156 sps:$4 sm:$0xff]   ;;  %v3747_v21 = vld [vmem:[#allocation5 + $0x500] ss:$156 sps:$4 sm:$0xff]  }
  0x86   : > { %433 = vmatprep.subr.bf16.mxu0 %v3668_v28  ;;  %476 = vmatprep.subr.bf16.mxu1 %v3671_v30  ;;  %v3752_v20 = vld [vmem:[#allocation5 + $0x50c] ss:$156 sps:$4 sm:$0xff]   ;;  %v3755_v22 = vld [vmem:[#allocation5 + $0x63c] ss:$156 sps:$4 sm:$0xff]   ;;  %v3758_v24 = vld [vmem:[#allocation5 + $0x644] ss:$156 sps:$4 sm:$0xff]  }
  0x87   : > { %v3750_v23 = vld [vmem:[#allocation5 + $0x508] ss:$156 sps:$4 sm:$0xff]   ;;  %v3753_v25 = vld [vmem:[#allocation5 + $0x638] ss:$156 sps:$4 sm:$0xff]   ;;  %v3756_v27 = vld [vmem:[#allocation5 + $0x640] ss:$156 sps:$4 sm:$0xff]  }
  0x88   : > { %v3761_v26 = vld [vmem:[#allocation5 + $0x774] ss:$156 sps:$4 sm:$0xff]   ;;  %v3764_v28 = vld [vmem:[#allocation5 + $0x77c] ss:$156 sps:$4 sm:$0xff]   ;;  %v3767_v30 = vld [vmem:[#allocation5 + $0x8ac] ss:$156 sps:$4 sm:$0xff]  }
  0x89   : > { %434 = vmatpush1.bf16.msra.mxu0 %v3670_v31  ;;  %477 = vmatpush1.bf16.msra.mxu1 %v3673_v32  ;;  %v3759_v29 = vld [vmem:[#allocation5 + $0x770] ss:$156 sps:$4 sm:$0xff]   ;;  %v3762_v31 = vld [vmem:[#allocation5 + $0x778] ss:$156 sps:$4 sm:$0xff]   ;;  %vm4259_vm0 = vmmov 0   ;;  %s3548_s18 = smul.u32 48, %s4456_s22 }
  0x8a   : > { %703 = vmatprep.subr.bf16.mxu0 %v3677_v33  ;;  %746 = vmatprep.subr.bf16.mxu1 %v3680_v35  ;;  %v3770_v32 = vld [vmem:[#allocation5 + $0x8b4] ss:$156 sps:$4 sm:$0xff]   ;;  %v3765_v33 = vld [vmem:[#allocation5 + $0x8a8] ss:$156 sps:$4 sm:$0xff]   ;;  %s3549_s26 = smul.u32 768, %s4304_s16  ;;  %s3079_s6 = scalar_lea.sflag [#allocation4], %s4456_s22 }
  0x8b   : > { %v3773_v35 = vld [vmem:[#allocation5 + $0x34] ss:$156 sps:$4 sm:$0xff]   ;;  %s4546_s20 = scalar_lea.vmem [#allocation8], %s3548_s18  ;;  %p4622_p0 = scmp.ne.s32.totalorder %s4617_s7, 0 }
  0x8c   : > { %452 = vmatmul.mubr.bf16.vlgmr.msra.gmra.mrb[0].mxu0 %v4473_v34  ;;  %495 = vmatmul.mubr.bf16.vlgmr.msra.gmra.mrb[0].mxu1 %v4473_v34  ;;  %s3093_s21 = sshll.u32 %s4546_s20, 4  ;;  %s4560_s23 = scalar_lea.hbm %s4608_s3, %s3549_s26  ;;  %s4554_s21 = int_to_ptr.vmem [resolvable:$true] %s3093_s21 }
  0x8d   : > { %704 = vmatpush1.bf16.msra.mxu0 %v3675_v36  ;;  %735 = vmatprep.mubr.bf16.mxu0 %v4257_v0  ;;  %v3768_v36 = vld [vmem:[#allocation5 + $0x8b0] ss:$156 sps:$4 sm:$0xff]   ;;  %s4178_s9 = scalar_lea.vmem %s4554_s21, 768  ;;  %s4260_s16 = smov [#allocation8]  }
  0x8e   : > { %705 = vmatprep.subr.bf16.mxu0 %v3683_v37  ;;  %747 = vmatpush1.bf16.msra.mxu1 %v3678_v38  ;;  %v3776_v37 = vld [vmem:[#allocation5 + $0x3c] ss:$156 sps:$4 sm:$0xff]   ;;  %v3771_v38 = vld [vmem:[#allocation5 + $0x30] ss:$156 sps:$4 sm:$0xff]   ;;  %p4179_p11 = scmp.ne.s32.totalorder %s4554_s21, %s4178_s9  ;;  %s4182_s10 = sshll.u32 %s4260_s16, 4  ;;  %s4183_s10 = int_to_ptr.vmem [resolvable:$false] %s4182_s10 }
  0x8f   : > { %778 = vmatprep.mubr.bf16.mxu1 %v4257_v0  ;;  %748 = vmatprep.subr.bf16.mxu1 %v3686_v39  ;;  %v3779_v39 = vld [vmem:[#allocation5 + $0x16c] ss:$156 sps:$4 sm:$0xff]   ;;  %s4184_s25 = scalar_lea.vmem %s4183_s10, 1536  ;;  %p4185_p7 = scmp.lt.s32.totalorder %s4554_s21, %s4183_s10 }
  0x90   : > { %p4180_p1 = pnand %p4179_p11, %p4622_p0  ;;  %p4186_p9 = scmp.lt.s32.totalorder %s4184_s25, %s4178_s9 }
  0x91   : > { %706 = vmatpush1.bf16.msra.mxu0 %v3681_v40  ;;  %v3774_v40 = vld [vmem:[#allocation5 + $0x38] ss:$156 sps:$4 sm:$0xff]  }
  0x92   : > { %707 = vmatprep.subr.bf16.mxu0 %v3689_v41  ;;  %749 = vmatpush1.bf16.msra.mxu1 %v3684_v42  ;;  %v3782_v41 = vld [vmem:[#allocation5 + $0x174] ss:$156 sps:$4 sm:$0xff]   ;;  %v3777_v42 = vld [vmem:[#allocation5 + $0x168] ss:$156 sps:$4 sm:$0xff]   ;;  %p4181_p3 = pneg %p4180_p1  ;;  %p4187_p12 = por %p4186_p9, %p4185_p7 }
  0x93   : > { %750 = vmatprep.subr.bf16.mxu1 %v3692_v43  ;;  %v3785_v43 = vld [vmem:[#allocation5 + $0x2a4] ss:$156 sps:$4 sm:$0xff]  }
  0x94   : > { %p4188_p2 = pnand %p4187_p12, %p4181_p3 }
  0x95   : > { %708 = vmatpush1.bf16.msra.mxu0 %v3687_v44  ;;  %v3780_v44 = vld [vmem:[#allocation5 + $0x170] ss:$156 sps:$4 sm:$0xff]  }
  0x96   : > { %709 = vmatprep.subr.bf16.mxu0 %v3695_v45  ;;  %751 = vmatpush1.bf16.msra.mxu1 %v3690_v46  ;;  %v3788_v45 = vld [vmem:[#allocation5 + $0x2ac] ss:$156 sps:$4 sm:$0xff]   ;;  %v3783_v46 = vld [vmem:[#allocation5 + $0x2a0] ss:$156 sps:$4 sm:$0xff]  }
  0x97   : > { %752 = vmatprep.subr.bf16.mxu1 %v3698_v47  ;;  %v3791_v47 = vld [vmem:[#allocation5 + $0x3dc] ss:$156 sps:$4 sm:$0xff]  }
  0x99   : > { %710 = vmatpush1.bf16.msra.mxu0 %v3693_v48  ;;  %v3786_v48 = vld [vmem:[#allocation5 + $0x2a8] ss:$156 sps:$4 sm:$0xff]  }
  0x9a   : > { %711 = vmatprep.subr.bf16.mxu0 %v3701_v49  ;;  %753 = vmatpush1.bf16.msra.mxu1 %v3696_v50  ;;  %v3794_v49 = vld [vmem:[#allocation5 + $0x3e4] ss:$156 sps:$4 sm:$0xff]   ;;  %v3789_v50 = vld [vmem:[#allocation5 + $0x3d8] ss:$156 sps:$4 sm:$0xff]  }
  0x9b   : > { %754 = vmatprep.subr.bf16.mxu1 %v3704_v51  ;;  %v3797_v51 = vld [vmem:[#allocation5 + $0x514] ss:$156 sps:$4 sm:$0xff]  }
  0x9d   : > { %712 = vmatpush1.bf16.msra.mxu0 %v3699_v52  ;;  %v3792_v52 = vld [vmem:[#allocation5 + $0x3e0] ss:$156 sps:$4 sm:$0xff]  }
  0x9e   : > { %713 = vmatprep.subr.bf16.mxu0 %v3707_v53  ;;  %755 = vmatpush1.bf16.msra.mxu1 %v3702_v54  ;;  %v3800_v53 = vld [vmem:[#allocation5 + $0x51c] ss:$156 sps:$4 sm:$0xff]   ;;  %v3795_v54 = vld [vmem:[#allocation5 + $0x510] ss:$156 sps:$4 sm:$0xff]  }
  0x9f   : > { %756 = vmatprep.subr.bf16.mxu1 %v3710_v55  ;;  %v3803_v55 = vld [vmem:[#allocation5 + $0x64c] ss:$156 sps:$4 sm:$0xff]  }
  0xa1   : > { %714 = vmatpush1.bf16.msra.mxu0 %v3705_v56  ;;  %v3798_v56 = vld [vmem:[#allocation5 + $0x518] ss:$156 sps:$4 sm:$0xff]  }
  0xa2   : > { %715 = vmatprep.subr.bf16.mxu0 %v3713_v57  ;;  %757 = vmatpush1.bf16.msra.mxu1 %v3708_v58  ;;  %v3806_v57 = vld [vmem:[#allocation5 + $0x654] ss:$156 sps:$4 sm:$0xff]   ;;  %v3801_v58 = vld [vmem:[#allocation5 + $0x648] ss:$156 sps:$4 sm:$0xff]  }
  0xa3   : > { %758 = vmatprep.subr.bf16.mxu1 %v3716_v59  ;;  %v3809_v59 = vld [vmem:[#allocation5 + $0x784] ss:$156 sps:$4 sm:$0xff]  }
  0xa5   : > { %716 = vmatpush1.bf16.msra.mxu0 %v3711_v60  ;;  %v3804_v60 = vld [vmem:[#allocation5 + $0x650] ss:$156 sps:$4 sm:$0xff]  }
  0xa6   : > { %717 = vmatprep.subr.bf16.mxu0 %v3719_v61  ;;  %759 = vmatpush1.bf16.msra.mxu1 %v3714_v62  ;;  %v3812_v61 = vld [vmem:[#allocation5 + $0x78c] ss:$156 sps:$4 sm:$0xff]   ;;  %v3807_v62 = vld [vmem:[#allocation5 + $0x780] ss:$156 sps:$4 sm:$0xff]  }
  0xa7   : > { %760 = vmatprep.subr.bf16.mxu1 %v3722_v63  ;;  %v3815_v63 = vld [vmem:[#allocation5 + $0x8bc] ss:$156 sps:$4 sm:$0xff]  }
  0xa9   : > { %718 = vmatpush1.bf16.msra.mxu0 %v3717_v1  ;;  %v3810_v1 = vld [vmem:[#allocation5 + $0x788] ss:$156 sps:$4 sm:$0xff]  }
  0xaa   : > { %989 = vmatprep.subr.bf16.mxu0 %v3725_v2  ;;  %761 = vmatpush1.bf16.msra.mxu1 %v3720_v3  ;;  %v3818_v2 = vld [vmem:[#allocation5 + $0x8c4] ss:$156 sps:$4 sm:$0xff]   ;;  %v3813_v3 = vld [vmem:[#allocation5 + $0x8b8] ss:$156 sps:$4 sm:$0xff]  }
  0xab   : > { %1032 = vmatprep.subr.bf16.mxu1 %v3728_v4  ;;  %v3821_v4 = vld [vmem:[#allocation5 + $0x44] ss:$156 sps:$4 sm:$0xff]  }
  0xac   : > { %736 = vmatmul.mubr.bf16.vlgmr.msra.gmra.mrb[4].mxu0 %v4473_v34 }
  0xad   : > { %990 = vmatpush1.bf16.msra.mxu0 %v3723_v5  ;;  %1021 = vmatprep.mubr.bf16.mxu0 %v4257_v0  ;;  %v3816_v5 = vld [vmem:[#allocation5 + $0x8c0] ss:$156 sps:$4 sm:$0xff]  }
  0xae   : > { %779 = vmatmul.mubr.bf16.vlgmr.msra.gmra.mrb[4].mxu1 %v4473_v34  ;;  %991 = vmatprep.subr.bf16.mxu0 %v3731_v6  ;;  %v3824_v6 = vld [vmem:[#allocation5 + $0x4c] ss:$156 sps:$4 sm:$0xff]  }
  0xaf   : > { %1033 = vmatpush1.bf16.msra.mxu1 %v3726_v7  ;;  %1064 = vmatprep.mubr.bf16.mxu1 %v4257_v0  ;;  %v3819_v7 = vld [vmem:[#allocation5 + $0x40] ss:$156 sps:$4 sm:$0xff]  }
  0xb0   : > { %1034 = vmatprep.subr.bf16.mxu1 %v3734_v8  ;;  %v3827_v8 = vld [vmem:[#allocation5 + $0x17c] ss:$156 sps:$4 sm:$0xff]  }
  0xb1   : > { %992 = vmatpush1.bf16.msra.mxu0 %v3729_v9  ;;  %v3822_v9 = vld [vmem:[#allocation5 + $0x48] ss:$156 sps:$4 sm:$0xff]  }
  0xb2   : > { %993 = vmatprep.subr.bf16.mxu0 %v3737_v10  ;;  %v3830_v10 = vld [vmem:[#allocation5 + $0x184] ss:$156 sps:$4 sm:$0xff]  }
  0xb3   : > { %1035 = vmatpush1.bf16.msra.mxu1 %v3732_v11  ;;  %v3825_v11 = vld [vmem:[#allocation5 + $0x178] ss:$156 sps:$4 sm:$0xff]  }
  0xb4   : > { %1036 = vmatprep.subr.bf16.mxu1 %v3740_v12  ;;  %v3833_v12 = vld [vmem:[#allocation5 + $0x2b4] ss:$156 sps:$4 sm:$0xff]  }
  0xb5   : > { %994 = vmatpush1.bf16.msra.mxu0 %v3735_v13  ;;  %v3828_v13 = vld [vmem:[#allocation5 + $0x180] ss:$156 sps:$4 sm:$0xff]  }
  0xb6   : > { %995 = vmatprep.subr.bf16.mxu0 %v3743_v14  ;;  %v3836_v14 = vld [vmem:[#allocation5 + $0x2bc] ss:$156 sps:$4 sm:$0xff]  }
  0xb7   : > { %1037 = vmatpush1.bf16.msra.mxu1 %v3738_v15  ;;  %v3831_v15 = vld [vmem:[#allocation5 + $0x2b0] ss:$156 sps:$4 sm:$0xff]  }
  0xb8   : > { %1038 = vmatprep.subr.bf16.mxu1 %v3746_v16  ;;  %v3839_v16 = vld [vmem:[#allocation5 + $0x3ec] ss:$156 sps:$4 sm:$0xff]  }
  0xb9   : > { %996 = vmatpush1.bf16.msra.mxu0 %v3741_v17  ;;  %v3834_v17 = vld [vmem:[#allocation5 + $0x2b8] ss:$156 sps:$4 sm:$0xff]  }
  0xba   : > { %997 = vmatprep.subr.bf16.mxu0 %v3749_v18  ;;  %v3842_v18 = vld [vmem:[#allocation5 + $0x3f4] ss:$156 sps:$4 sm:$0xff]  }
  0xbb   : > { %1039 = vmatpush1.bf16.msra.mxu1 %v3744_v19  ;;  %v3837_v19 = vld [vmem:[#allocation5 + $0x3e8] ss:$156 sps:$4 sm:$0xff]  }
  0xbc   : > { %1040 = vmatprep.subr.bf16.mxu1 %v3752_v20  ;;  %v3845_v20 = vld [vmem:[#allocation5 + $0x524] ss:$156 sps:$4 sm:$0xff]  }
  0xbd   : > { %998 = vmatpush1.bf16.msra.mxu0 %v3747_v21  ;;  %v3840_v21 = vld [vmem:[#allocation5 + $0x3f0] ss:$156 sps:$4 sm:$0xff]  }
  0xbe   : > { %999 = vmatprep.subr.bf16.mxu0 %v3755_v22  ;;  %v3848_v22 = vld [vmem:[#allocation5 + $0x52c] ss:$156 sps:$4 sm:$0xff]  }
  0xbf   : > { %1041 = vmatpush1.bf16.msra.mxu1 %v3750_v23  ;;  %v3843_v23 = vld [vmem:[#allocation5 + $0x520] ss:$156 sps:$4 sm:$0xff]  }
  0xc0   : > { %1042 = vmatprep.subr.bf16.mxu1 %v3758_v24  ;;  %v3851_v24 = vld [vmem:[#allocation5 + $0x65c] ss:$156 sps:$4 sm:$0xff]  }
  0xc1   : > { %1000 = vmatpush1.bf16.msra.mxu0 %v3753_v25  ;;  %v3846_v25 = vld [vmem:[#allocation5 + $0x528] ss:$156 sps:$4 sm:$0xff]  }
  0xc2   : > { %1001 = vmatprep.subr.bf16.mxu0 %v3761_v26  ;;  %v3854_v26 = vld [vmem:[#allocation5 + $0x664] ss:$156 sps:$4 sm:$0xff]  }
  0xc3   : > { %1043 = vmatpush1.bf16.msra.mxu1 %v3756_v27  ;;  %v3849_v27 = vld [vmem:[#allocation5 + $0x658] ss:$156 sps:$4 sm:$0xff]  }
  0xc4   : > { %1044 = vmatprep.subr.bf16.mxu1 %v3764_v28  ;;  %v3857_v28 = vld [vmem:[#allocation5 + $0x794] ss:$156 sps:$4 sm:$0xff]  }
  0xc5   : > { %1002 = vmatpush1.bf16.msra.mxu0 %v3759_v29  ;;  %v3852_v29 = vld [vmem:[#allocation5 + $0x660] ss:$156 sps:$4 sm:$0xff]  }
  0xc6   : > { %1003 = vmatprep.subr.bf16.mxu0 %v3767_v30  ;;  %v3860_v30 = vld [vmem:[#allocation5 + $0x79c] ss:$156 sps:$4 sm:$0xff]  }
  0xc7   : > { %1045 = vmatpush1.bf16.msra.mxu1 %v3762_v31  ;;  %v3855_v31 = vld [vmem:[#allocation5 + $0x790] ss:$156 sps:$4 sm:$0xff]  }
  0xc8   : > { %1046 = vmatprep.subr.bf16.mxu1 %v3770_v32  ;;  %v3863_v32 = vld [vmem:[#allocation5 + $0x8cc] ss:$156 sps:$4 sm:$0xff]  }
  0xc9   : > { %1004 = vmatpush1.bf16.msra.mxu0 %v3765_v33  ;;  %v3858_v33 = vld [vmem:[#allocation5 + $0x798] ss:$156 sps:$4 sm:$0xff]  }
  0xca   : > { %1179 = vmatprep.subr.bf16.mxu0 %v3773_v35  ;;  %v3866_v35 = vld [vmem:[#allocation5 + $0x8d4] ss:$156 sps:$4 sm:$0xff]  }
  0xcb   : > { %1047 = vmatpush1.bf16.msra.mxu1 %v3768_v36  ;;  %v3861_v36 = vld [vmem:[#allocation5 + $0x8c8] ss:$156 sps:$4 sm:$0xff]  }
  0xcc   : > { %1022 = vmatmul.mubr.bf16.vlgmr.msra.gmra.mrb[8].mxu0 %v4473_v34  ;;  %1429 = vmatprep.subr.bf16.mxu1 %v3776_v37  ;;  %v3869_v37 = vld [vmem:[#allocation5 + $0x54] ss:$156 sps:$4 sm:$0xff]  }
  0xcd   : > { %1180 = vmatpush1.bf16.msra.mxu0 %v3771_v38  ;;  %1211 = vmatprep.mubr.bf16.mxu0 %v4257_v0  ;;  %v3864_v38 = vld [vmem:[#allocation5 + $0x8d0] ss:$156 sps:$4 sm:$0xff]  }
  0xce   : > { %1065 = vmatmul.mubr.bf16.vlgmr.msra.gmra.mrb[8].mxu1 %v4473_v34  ;;  %1181 = vmatprep.subr.bf16.mxu0 %v3779_v39  ;;  %v3872_v39 = vld [vmem:[#allocation5 + $0x5c] ss:$156 sps:$4 sm:$0xff]  }
  0xcf   : > { %1430 = vmatpush1.bf16.msra.mxu1 %v3774_v40  ;;  %1461 = vmatprep.mubr.bf16.mxu1 %v4257_v0  ;;  %v3867_v40 = vld [vmem:[#allocation5 + $0x50] ss:$156 sps:$4 sm:$0xff]  }
  0xd0   : > { %1431 = vmatprep.subr.bf16.mxu1 %v3782_v41  ;;  %v3875_v41 = vld [vmem:[#allocation5 + $0x18c] ss:$156 sps:$4 sm:$0xff]  }
  0xd1   : > { %1182 = vmatpush1.bf16.msra.mxu0 %v3777_v42  ;;  %v3870_v42 = vld [vmem:[#allocation5 + $0x58] ss:$156 sps:$4 sm:$0xff]  }
  0xd2   : > { %1183 = vmatprep.subr.bf16.mxu0 %v3785_v43  ;;  %v3878_v43 = vld [vmem:[#allocation5 + $0x194] ss:$156 sps:$4 sm:$0xff]  }
  0xd3   : > { %1432 = vmatpush1.bf16.msra.mxu1 %v3780_v44  ;;  %v3873_v44 = vld [vmem:[#allocation5 + $0x188] ss:$156 sps:$4 sm:$0xff]  }
  0xd4   : > { %1433 = vmatprep.subr.bf16.mxu1 %v3788_v45  ;;  %v3881_v45 = vld [vmem:[#allocation5 + $0x2c4] ss:$156 sps:$4 sm:$0xff]  }
  0xd5   : > { %1184 = vmatpush1.bf16.msra.mxu0 %v3783_v46  ;;  %v3876_v46 = vld [vmem:[#allocation5 + $0x190] ss:$156 sps:$4 sm:$0xff]  }
  0xd6   : > { %1185 = vmatprep.subr.bf16.mxu0 %v3791_v47  ;;  %v3884_v47 = vld [vmem:[#allocation5 + $0x2cc] ss:$156 sps:$4 sm:$0xff]  }
  0xd7   : > { %1434 = vmatpush1.bf16.msra.mxu1 %v3786_v48  ;;  %v3879_v48 = vld [vmem:[#allocation5 + $0x2c0] ss:$156 sps:$4 sm:$0xff]  }
  0xd8   : > { %1435 = vmatprep.subr.bf16.mxu1 %v3794_v49  ;;  %v3887_v49 = vld [vmem:[#allocation5 + $0x3fc] ss:$156 sps:$4 sm:$0xff]  }
  0xd9   : > { %1186 = vmatpush1.bf16.msra.mxu0 %v3789_v50  ;;  %v3882_v50 = vld [vmem:[#allocation5 + $0x2c8] ss:$156 sps:$4 sm:$0xff]  }
  0xda   : > { %1187 = vmatprep.subr.bf16.mxu0 %v3797_v51  ;;  %v3890_v51 = vld [vmem:[#allocation5 + $0x404] ss:$156 sps:$4 sm:$0xff]  }
  0xdb   : > { %1436 = vmatpush1.bf16.msra.mxu1 %v3792_v52  ;;  %v3885_v52 = vld [vmem:[#allocation5 + $0x3f8] ss:$156 sps:$4 sm:$0xff]  }
  0xdc   : > { %1437 = vmatprep.subr.bf16.mxu1 %v3800_v53  ;;  %v3888_v53 = vld [vmem:[#allocation5 + $0x400] ss:$156 sps:$4 sm:$0xff]  }
  0xdd   : > { %1188 = vmatpush1.bf16.msra.mxu0 %v3795_v54  ;;  %v3896_v54 = vld [vmem:[#allocation5 + $0x53c] ss:$156 sps:$4 sm:$0xff]  }
  0xde   : > { %1189 = vmatprep.subr.bf16.mxu0 %v3803_v55  ;;  %v3891_v55 = vld [vmem:[#allocation5 + $0x530] ss:$156 sps:$4 sm:$0xff]  }
  0xdf   : > { %1438 = vmatpush1.bf16.msra.mxu1 %v3798_v56  ;;  %v3899_v56 = vld [vmem:[#allocation5 + $0x66c] ss:$156 sps:$4 sm:$0xff]  }
  0xe0   : > { %1439 = vmatprep.subr.bf16.mxu1 %v3806_v57  ;;  %v3894_v57 = vld [vmem:[#allocation5 + $0x538] ss:$156 sps:$4 sm:$0xff]  }
  0xe1   : > { %1190 = vmatpush1.bf16.msra.mxu0 %v3801_v58  ;;  %v3902_v58 = vld [vmem:[#allocation5 + $0x674] ss:$156 sps:$4 sm:$0xff]  }
  0xe2   : > { %1191 = vmatprep.subr.bf16.mxu0 %v3809_v59  ;;  %v3897_v59 = vld [vmem:[#allocation5 + $0x668] ss:$156 sps:$4 sm:$0xff]  }
  0xe3   : > { %1440 = vmatpush1.bf16.msra.mxu1 %v3804_v60  ;;  %v3905_v60 = vld [vmem:[#allocation5 + $0x7a4] ss:$156 sps:$4 sm:$0xff]  }
  0xe4   : > { %1441 = vmatprep.subr.bf16.mxu1 %v3812_v61  ;;  %v3900_v61 = vld [vmem:[#allocation5 + $0x670] ss:$156 sps:$4 sm:$0xff]  }
  0xe5   : > { %1192 = vmatpush1.bf16.msra.mxu0 %v3807_v62  ;;  %v3908_v62 = vld [vmem:[#allocation5 + $0x7ac] ss:$156 sps:$4 sm:$0xff]  }
  0xe6   : > { %1193 = vmatprep.subr.bf16.mxu0 %v3815_v63  ;;  %v3903_v63 = vld [vmem:[#allocation5 + $0x7a0] ss:$156 sps:$4 sm:$0xff]  }
  0xe7   : > { %1442 = vmatpush1.bf16.msra.mxu1 %v3810_v1  ;;  %v3911_v1 = vld [vmem:[#allocation5 + $0x8dc] ss:$156 sps:$4 sm:$0xff]  }
  0xe8   : > { %1443 = vmatprep.subr.bf16.mxu1 %v3818_v2  ;;  %v3906_v2 = vld [vmem:[#allocation5 + $0x7a8] ss:$156 sps:$4 sm:$0xff]  }
  0xe9   : > { %1194 = vmatpush1.bf16.msra.mxu0 %v3813_v3  ;;  %v3914_v3 = vld [vmem:[#allocation5 + $0x8e4] ss:$156 sps:$4 sm:$0xff]  }
  0xea   : > { %1472 = vmatprep.subr.bf16.mxu0 %v3821_v4  ;;  %v3909_v4 = vld [vmem:[#allocation5 + $0x8d8] ss:$156 sps:$4 sm:$0xff]  }
  0xeb   : > { %1444 = vmatpush1.bf16.msra.mxu1 %v3816_v5  ;;  %v3917_v5 = vld [vmem:[#allocation5 + $0x64] ss:$156 sps:$4 sm:$0xff]  }
  0xec   : > { %1212 = vmatmul.mubr.bf16.vlgmr.msra.gmra.mrb[12].mxu0 %v4473_v34  ;;  %1713 = vmatprep.subr.bf16.mxu1 %v3824_v6  ;;  %v3912_v6 = vld [vmem:[#allocation5 + $0x8e0] ss:$156 sps:$4 sm:$0xff]  }
  0xed   : > { %1473 = vmatpush1.bf16.msra.mxu0 %v3819_v7  ;;  %1504 = vmatprep.mubr.bf16.mxu0 %v4257_v0  ;;  %v3915_v7 = vld [vmem:[#allocation5 + $0x60] ss:$156 sps:$4 sm:$0xff]  }
  0xee   : > { %1462 = vmatmul.mubr.bf16.vlgmr.msra.gmra.mrb[12].mxu1 %v4473_v34  ;;  %1474 = vmatprep.subr.bf16.mxu0 %v3827_v8  ;;  %v3921_v8 = vld [vmem:[#allocation5 + $0x19c] ss:$156 sps:$4 sm:$0xff]  }
  0xef   : > { %1714 = vmatpush1.bf16.msra.mxu1 %v3822_v9  ;;  %1745 = vmatprep.mubr.bf16.mxu1 %v4257_v0  ;;  %v3918_v9 = vld [vmem:[#allocation5 + $0x68] ss:$156 sps:$4 sm:$0xff]  }
  0xf0   : > { %1715 = vmatprep.subr.bf16.mxu1 %v3830_v10  ;;  %v4496_v10 = vld [vmem:[%s4460_s4] sm:$0xff]  }
  0xf1   : > { %1475 = vmatpush1.bf16.msra.mxu0 %v3825_v11  ;;  %v4258_v11 = vmov 0.0  }
  0xf2   : > { %1476 = vmatprep.subr.bf16.mxu0 %v3833_v12  ;;  %v3919_v12 = vld [vmem:[#allocation5 + $0x198] ss:$156 sps:$4 sm:$0xff]  }
  0xf3   : > { %1716 = vmatpush1.bf16.msra.mxu1 %v3828_v13  ;;  %v3925_v13 = vld [vmem:[#allocation5 + $0x2d4] ss:$156 sps:$4 sm:$0xff]  }
  0xf4   : > { %1717 = vmatprep.subr.bf16.mxu1 %v3836_v14  ;;  %v3922_v14 = vld [vmem:[#allocation5 + $0x1a0] ss:$156 sps:$4 sm:$0xff]  }
  0xf5   : > { %1477 = vmatpush1.bf16.msra.mxu0 %v3831_v15  ;;  %v3923_v15 = vld [vmem:[#allocation5 + $0x2d0] ss:$156 sps:$4 sm:$0xff]  }
  0xf6   : > { %1478 = vmatprep.subr.bf16.mxu0 %v3839_v16  ;;  %v3929_v16 = vld [vmem:[#allocation5 + $0x40c] ss:$156 sps:$4 sm:$0xff]  }
  0xf7   : > { %1718 = vmatpush1.bf16.msra.mxu1 %v3834_v17  ;;  %v3926_v17 = vld [vmem:[#allocation5 + $0x2d8] ss:$156 sps:$4 sm:$0xff]  }
  0xf8   : > { %1719 = vmatprep.subr.bf16.mxu1 %v3842_v18  ;;  %v3927_v18 = vld [vmem:[#allocation5 + $0x408] ss:$156 sps:$4 sm:$0xff]  }
  0xf9   : > { %1479 = vmatpush1.bf16.msra.mxu0 %v3837_v19  ;;  %v3933_v19 = vld [vmem:[#allocation5 + $0x544] ss:$156 sps:$4 sm:$0xff]  }
  0xfa   : > { %1480 = vmatprep.subr.bf16.mxu0 %v3845_v20  ;;  %v3930_v20 = vld [vmem:[#allocation5 + $0x410] ss:$156 sps:$4 sm:$0xff]  }
  0xfb   : > { %1720 = vmatpush1.bf16.msra.mxu1 %v3840_v21  ;;  %v3931_v21 = vld [vmem:[#allocation5 + $0x540] ss:$156 sps:$4 sm:$0xff]  }
  0xfc   : > { %1721 = vmatprep.subr.bf16.mxu1 %v3848_v22  ;;  %v3937_v22 = vld [vmem:[#allocation5 + $0x67c] ss:$156 sps:$4 sm:$0xff]  }
  0xfd   : > { %1481 = vmatpush1.bf16.msra.mxu0 %v3843_v23  ;;  %v3934_v23 = vld [vmem:[#allocation5 + $0x548] ss:$156 sps:$4 sm:$0xff]  }
  0xfe   : > { %1482 = vmatprep.subr.bf16.mxu0 %v3851_v24  ;;  %v3935_v24 = vld [vmem:[#allocation5 + $0x678] ss:$156 sps:$4 sm:$0xff]  }
  0xff   : > { %1722 = vmatpush1.bf16.msra.mxu1 %v3846_v25  ;;  %v3941_v25 = vld [vmem:[#allocation5 + $0x7b4] ss:$156 sps:$4 sm:$0xff]  }
 0x100   : > { %1723 = vmatprep.subr.bf16.mxu1 %v3854_v26  ;;  %v3938_v26 = vld [vmem:[#allocation5 + $0x680] ss:$156 sps:$4 sm:$0xff]  }
 0x101   : > { %1483 = vmatpush1.bf16.msra.mxu0 %v3849_v27  ;;  %v3939_v27 = vld [vmem:[#allocation5 + $0x7b0] ss:$156 sps:$4 sm:$0xff]  }
 0x102   : > { %1484 = vmatprep.subr.bf16.mxu0 %v3857_v28  ;;  %v3945_v28 = vld [vmem:[#allocation5 + $0x8ec] ss:$156 sps:$4 sm:$0xff]  }
 0x103   : > { %1724 = vmatpush1.bf16.msra.mxu1 %v3852_v29  ;;  %v3942_v29 = vld [vmem:[#allocation5 + $0x7b8] ss:$156 sps:$4 sm:$0xff]  }
 0x104   : > { %1725 = vmatprep.subr.bf16.mxu1 %v3860_v30  ;;  %v3943_v30 = vld [vmem:[#allocation5 + $0x8e8] ss:$156 sps:$4 sm:$0xff]  }
 0x105   : > { %1485 = vmatpush1.bf16.msra.mxu0 %v3855_v31  ;;  %v3949_v31 = vld [vmem:[#allocation5 + $0x70] ss:$156 sps:$4 sm:$0xff]  }
 0x106   : > { %1486 = vmatprep.subr.bf16.mxu0 %v3863_v32  ;;  %v3946_v32 = vld [vmem:[#allocation5 + $0x8f0] ss:$156 sps:$4 sm:$0xff]  }
 0x107   : > { %1726 = vmatpush1.bf16.msra.mxu1 %v3858_v33  ;;  %v3952_v33 = vld [vmem:[#allocation5 + $0x78] ss:$156 sps:$4 sm:$0xff]  }
 0x108   : > { %1727 = vmatprep.subr.bf16.mxu1 %v3866_v35  ;;  %v3947_v35 = vld [vmem:[#allocation5 + $0x6c] ss:$156 sps:$4 sm:$0xff]  }
 0x109   : > { %1487 = vmatpush1.bf16.msra.mxu0 %v3861_v36  ;;  %v3955_v36 = vld [vmem:[#allocation5 + $0x1a8] ss:$156 sps:$4 sm:$0xff]  }
 0x10a   : > { %1756 = vmatprep.subr.bf16.mxu0 %v3869_v37  ;;  %v3950_v37 = vld [vmem:[#allocation5 + $0x74] ss:$156 sps:$4 sm:$0xff]  }
 0x10b   : > { %1728 = vmatpush1.bf16.msra.mxu1 %v3864_v38  ;;  %v3958_v38 = vld [vmem:[#allocation5 + $0x1b0] ss:$156 sps:$4 sm:$0xff]  }
 0x10c   : > { %1505 = vmatmul.mubr.bf16.vlgmr.msra.gmra.mrb[16].mxu0 %v4473_v34  ;;  %1999 = vmatprep.subr.bf16.mxu1 %v3872_v39  ;;  %v3953_v39 = vld [vmem:[#allocation5 + $0x1a4] ss:$156 sps:$4 sm:$0xff]  }
 0x10d   : > { %1757 = vmatpush1.bf16.msra.mxu0 %v3867_v40  ;;  %1788 = vmatprep.mubr.bf16.mxu0 %v4257_v0  ;;  %v3961_v40 = vld [vmem:[#allocation5 + $0x2e0] ss:$156 sps:$4 sm:$0xff]  }
 0x10e   : > { %1746 = vmatmul.mubr.bf16.vlgmr.msra.gmra.mrb[16].mxu1 %v4473_v34  ;;  %1758 = vmatprep.subr.bf16.mxu0 %v3875_v41  ;;  %v3893_v34 = vld [vmem:[#allocation5 + $0x534] ss:$156 sps:$4 sm:$0xff]   ;;  %v3956_v41 = vld [vmem:[#allocation5 + $0x1ac] ss:$156 sps:$4 sm:$0xff]  }
 0x10f   : > { %2000 = vmatpush1.bf16.msra.mxu1 %v3870_v42  ;;  %2031 = vmatprep.mubr.bf16.mxu1 %v4257_v0  ;;  %v3964_v42 = vld [vmem:[#allocation5 + $0x2e8] ss:$156 sps:$4 sm:$0xff]  }
 0x110   : > { %2001 = vmatprep.subr.bf16.mxu1 %v3878_v43  ;;  %v3959_v43 = vld [vmem:[#allocation5 + $0x2dc] ss:$156 sps:$4 sm:$0xff]  }
 0x111   : > { %1759 = vmatpush1.bf16.msra.mxu0 %v3873_v44  ;;  %v3967_v44 = vld [vmem:[#allocation5 + $0x418] ss:$156 sps:$4 sm:$0xff]  }
 0x112   : > { %1760 = vmatprep.subr.bf16.mxu0 %v3881_v45  ;;  %v3962_v45 = vld [vmem:[#allocation5 + $0x2e4] ss:$156 sps:$4 sm:$0xff]  }
 0x113   : > { %2002 = vmatpush1.bf16.msra.mxu1 %v3876_v46  ;;  %v3970_v46 = vld [vmem:[#allocation5 + $0x420] ss:$156 sps:$4 sm:$0xff]  }
 0x114   : > { %2003 = vmatprep.subr.bf16.mxu1 %v3884_v47  ;;  %v3965_v47 = vld [vmem:[#allocation5 + $0x414] ss:$156 sps:$4 sm:$0xff]  }
 0x115   : > { %1761 = vmatpush1.bf16.msra.mxu0 %v3879_v48  ;;  %v3973_v48 = vld [vmem:[#allocation5 + $0x550] ss:$156 sps:$4 sm:$0xff]  }
 0x116   : > { %1762 = vmatprep.subr.bf16.mxu0 %v3887_v49  ;;  %v3968_v49 = vld [vmem:[#allocation5 + $0x41c] ss:$156 sps:$4 sm:$0xff]  }
 0x117   : > { %2004 = vmatpush1.bf16.msra.mxu1 %v3882_v50  ;;  %v3976_v50 = vld [vmem:[#allocation5 + $0x558] ss:$156 sps:$4 sm:$0xff]  }
 0x118   : > { %2005 = vmatprep.subr.bf16.mxu1 %v3890_v51  ;;  %v3971_v51 = vld [vmem:[#allocation5 + $0x54c] ss:$156 sps:$4 sm:$0xff]  }
 0x119   : > { %1763 = vmatpush1.bf16.msra.mxu0 %v3885_v52  ;;  %v3979_v52 = vld [vmem:[#allocation5 + $0x688] ss:$156 sps:$4 sm:$0xff]  }
 0x11a   : > { %1764 = vmatprep.subr.bf16.mxu0 %v3893_v34  ;;  %v3974_v34 = vld [vmem:[#allocation5 + $0x554] ss:$156 sps:$4 sm:$0xff]  }
 0x11b   : > { %2006 = vmatpush1.bf16.msra.mxu1 %v3888_v53  ;;  %v3982_v53 = vld [vmem:[#allocation5 + $0x690] ss:$156 sps:$4 sm:$0xff]  }
 0x11c   : > { %2007 = vmatprep.subr.bf16.mxu1 %v3896_v54  ;;  %v3977_v54 = vld [vmem:[#allocation5 + $0x684] ss:$156 sps:$4 sm:$0xff]  }
 0x11d   : > { %1765 = vmatpush1.bf16.msra.mxu0 %v3891_v55  ;;  %v3985_v55 = vld [vmem:[#allocation5 + $0x7c0] ss:$156 sps:$4 sm:$0xff]  }
 0x11e   : > { %1766 = vmatprep.subr.bf16.mxu0 %v3899_v56 }
 0x11f   : > { %2008 = vmatpush1.bf16.msra.mxu1 %v3894_v57  ;;  %v3980_v57 = vld [vmem:[#allocation5 + $0x68c] ss:$156 sps:$4 sm:$0xff]  }
 0x120   : > { %2009 = vmatprep.subr.bf16.mxu1 %v3902_v58 }
 0x121   : > { %1767 = vmatpush1.bf16.msra.mxu0 %v3897_v59  ;;  %v3988_v59 = vld [vmem:[#allocation5 + $0x7c8] ss:$156 sps:$4 sm:$0xff]  }
 0x122   : > { %1768 = vmatprep.subr.bf16.mxu0 %v3905_v60 }
 0x123   : > { %2010 = vmatpush1.bf16.msra.mxu1 %v3900_v61 }
 0x124   : > { %2011 = vmatprep.subr.bf16.mxu1 %v3908_v62 }
 0x125   : > { %1769 = vmatpush1.bf16.msra.mxu0 %v3903_v63  ;;  %v3983_v63 = vld [vmem:[#allocation5 + $0x7bc] ss:$156 sps:$4 sm:$0xff]  }
 0x126   : > { %1770 = vmatprep.subr.bf16.mxu0 %v3911_v1 }
 0x127   : > { %2012 = vmatpush1.bf16.msra.mxu1 %v3906_v2 }
 0x128   : > { %2013 = vmatprep.subr.bf16.mxu1 %v3914_v3  ;;  %v3991_v3 = vld [vmem:[#allocation5 + $0x8f8] ss:$156 sps:$4 sm:$0xff]  }
 0x129   : > { %1771 = vmatpush1.bf16.msra.mxu0 %v3909_v4 }
 0x12a   : > { %2042 = vmatprep.subr.bf16.mxu0 %v3917_v5 }
 0x12b   : > { %2014 = vmatpush1.bf16.msra.mxu1 %v3912_v6 }
 0x12c   : > { %1789 = vmatmul.mubr.bf16.vlgmr.msra.gmra.mrb[20].mxu0 %v4496_v10  ;;  %3528 = vmatprep.subr.bf16.mxu1 %v4258_v11 }
 0x12d   : > { %2043 = vmatpush1.bf16.msra.mxu0 %v3915_v7  ;;  %2074 = vmatprep.mubr.bf16.mxu0 %v4257_v0  ;;  %v3986_v7 = vld [vmem:[#allocation5 + $0x7c4] ss:$156 sps:$4 sm:$0xff]  }
 0x12e   : > { %2032 = vmatmul.mubr.bf16.vlgmr.msra.gmra.mrb[20].mxu1 %v4496_v10  ;;  %2044 = vmatprep.subr.bf16.mxu0 %v3921_v8 }
 0x12f   : > { %3529 = vmatpush3.bf16.msra.mxu1 %v3918_v9  ;;  %3544 = vmatprep.mubr.msk.bf16.mxu1 %vm4259_vm0, %v4258_v11  ;;  %v3994_v9 = vld [vmem:[#allocation5 + $0x900] ss:$156 sps:$4 sm:$0xff]  }
 0x130   : > { %3530 = vmatprep.subr.bf16.mxu1 %v4258_v11 }
 0x131   : > { %2045 = vmatpush1.bf16.msra.mxu0 %v3919_v12 }
 0x132   : > { %2046 = vmatprep.subr.bf16.mxu0 %v3925_v13  ;;  %v3989_v13 = vld [vmem:[#allocation5 + $0x8f4] ss:$156 sps:$4 sm:$0xff]  }
 0x133   : > { %3531 = vmatpush3.bf16.msra.mxu1 %v3922_v14  ;;  %v3997_v14 = vld [vmem:[#allocation5 + $0x80] ss:$156 sps:$4 sm:$0xff]  }
 0x134   : > { %3532 = vmatprep.subr.bf16.mxu1 %v4258_v11 }
 0x135   : > { %2047 = vmatpush1.bf16.msra.mxu0 %v3923_v15 }
 0x136   : > { %2048 = vmatprep.subr.bf16.mxu0 %v3929_v16  ;;  %v3992_v16 = vld [vmem:[#allocation5 + $0x8fc] ss:$156 sps:$4 sm:$0xff]  }
 0x137   : > { %3533 = vmatpush3.bf16.msra.mxu1 %v3926_v17  ;;  %v4000_v17 = vld [vmem:[#allocation5 + $0x88] ss:$156 sps:$4 sm:$0xff]  }
 0x138   : > { %3534 = vmatprep.subr.bf16.mxu1 %v4258_v11 }
 0x139   : > { %2049 = vmatpush1.bf16.msra.mxu0 %v3927_v18  ;;  %v3995_v18 = vld [vmem:[#allocation5 + $0x7c] ss:$156 sps:$4 sm:$0xff]  }
 0x13a   : > { %2050 = vmatprep.subr.bf16.mxu0 %v3933_v19  ;;  %v4003_v19 = vld [vmem:[#allocation5 + $0x1b8] ss:$156 sps:$4 sm:$0xff]  }
 0x13b   : > { %3535 = vmatpush3.bf16.msra.mxu1 %v3930_v20  ;;  %v3998_v20 = vld [vmem:[#allocation5 + $0x84] ss:$156 sps:$4 sm:$0xff]  }
 0x13c   : > { %3536 = vmatprep.subr.bf16.mxu1 %v4258_v11 }
 0x13d   : > { %2051 = vmatpush1.bf16.msra.mxu0 %v3931_v21  ;;  %v4006_v21 = vld [vmem:[#allocation5 + $0x1c0] ss:$156 sps:$4 sm:$0xff]  }
 0x13e   : > { %2052 = vmatprep.subr.bf16.mxu0 %v3937_v22  ;;  %v4001_v22 = vld [vmem:[#allocation5 + $0x1b4] ss:$156 sps:$4 sm:$0xff]  }
 0x13f   : > { %3537 = vmatpush3.bf16.msra.mxu1 %v3934_v23  ;;  %v4009_v23 = vld [vmem:[#allocation5 + $0x2f0] ss:$156 sps:$4 sm:$0xff]  }
 0x140   : > { %3538 = vmatprep.subr.bf16.mxu1 %v4258_v11 }
 0x141   : > { %2053 = vmatpush1.bf16.msra.mxu0 %v3935_v24  ;;  %v4004_v24 = vld [vmem:[#allocation5 + $0x1bc] ss:$156 sps:$4 sm:$0xff]  }
 0x142   : > { %2054 = vmatprep.subr.bf16.mxu0 %v3941_v25  ;;  %v4012_v25 = vld [vmem:[#allocation5 + $0x2f8] ss:$156 sps:$4 sm:$0xff]  }
 0x143   : > { %3539 = vmatpush3.bf16.msra.mxu1 %v3938_v26  ;;  %v4007_v26 = vld [vmem:[#allocation5 + $0x2ec] ss:$156 sps:$4 sm:$0xff]  }
 0x144   : > { %3540 = vmatprep.subr.bf16.mxu1 %v4258_v11 }
 0x145   : > { %2055 = vmatpush1.bf16.msra.mxu0 %v3939_v27  ;;  %v4015_v27 = vld [vmem:[#allocation5 + $0x428] ss:$156 sps:$4 sm:$0xff]  }
 0x146   : > { %2056 = vmatprep.subr.bf16.mxu0 %v3945_v28  ;;  %v4010_v28 = vld [vmem:[#allocation5 + $0x2f4] ss:$156 sps:$4 sm:$0xff]  }
 0x147   : > { %3541 = vmatpush3.bf16.msra.mxu1 %v3942_v29  ;;  %v4018_v29 = vld [vmem:[#allocation5 + $0x430] ss:$156 sps:$4 sm:$0xff]  }
 0x148   : > { %3542 = vmatprep.subr.bf16.mxu1 %v4258_v11 }
 0x149   : > { %2057 = vmatpush1.bf16.msra.mxu0 %v3943_v30  ;;  %v4013_v30 = vld [vmem:[#allocation5 + $0x424] ss:$156 sps:$4 sm:$0xff]  }
 0x14a   : > { %2403 = vmatprep.subr.bf16.mxu0 %v3949_v31  ;;  %v4021_v31 = vld [vmem:[#allocation5 + $0x560] ss:$156 sps:$4 sm:$0xff]  }
 0x14b   : > { %3543 = vmatpush3.bf16.msra.mxu1 %v3946_v32  ;;  %v4016_v32 = vld [vmem:[#allocation5 + $0x42c] ss:$156 sps:$4 sm:$0xff]  }
 0x14c   : > { %2075 = vmatmul.mubr.bf16.vlgmr.msra.gmra.mrb[24].mxu0 %v4496_v10  ;;  %2446 = vmatprep.subr.bf16.mxu1 %v3952_v33  ;;  %v4024_v33 = vld [vmem:[#allocation5 + $0x568] ss:$156 sps:$4 sm:$0xff]  }
 0x14d   : > { %2404 = vmatpush1.bf16.msra.mxu0 %v3947_v35  ;;  %2435 = vmatprep.mubr.bf16.mxu0 %v4257_v0  ;;  %v4019_v35 = vld [vmem:[#allocation5 + $0x55c] ss:$156 sps:$4 sm:$0xff]  }
 0x14e   : > { %3545 = vmatmul.mubr.bf16.vlgmr.msra.gmra.mrb[24].mxu1 %v4496_v10  ;;  %2405 = vmatprep.subr.bf16.mxu0 %v3955_v36  ;;  %v4027_v36 = vld [vmem:[#allocation5 + $0x698] ss:$156 sps:$4 sm:$0xff]  }
 0x14f   : > { %2447 = vmatpush1.bf16.msra.mxu1 %v3950_v37  ;;  %2478 = vmatprep.mubr.bf16.mxu1 %v4257_v0  ;;  %v4022_v37 = vld [vmem:[#allocation5 + $0x564] ss:$156 sps:$4 sm:$0xff]  }
 0x150   : > { %2448 = vmatprep.subr.bf16.mxu1 %v3958_v38  ;;  %v4030_v38 = vld [vmem:[#allocation5 + $0x6a0] ss:$156 sps:$4 sm:$0xff]  }
 0x151   : > { %2406 = vmatpush1.bf16.msra.mxu0 %v3953_v39  ;;  %v4025_v39 = vld [vmem:[#allocation5 + $0x694] ss:$156 sps:$4 sm:$0xff]  }
 0x152   : > { %2407 = vmatprep.subr.bf16.mxu0 %v3961_v40  ;;  %v4033_v40 = vld [vmem:[#allocation5 + $0x7d0] ss:$156 sps:$4 sm:$0xff]  }
 0x153   : > { %2449 = vmatpush1.bf16.msra.mxu1 %v3956_v41 }
 0x154   : > { %2450 = vmatprep.subr.bf16.mxu1 %v3964_v42  ;;  %v4028_v42 = vld [vmem:[#allocation5 + $0x69c] ss:$156 sps:$4 sm:$0xff]  }
 0x155   : > { %2408 = vmatpush1.bf16.msra.mxu0 %v3959_v43 }
 0x156   : > { %2409 = vmatprep.subr.bf16.mxu0 %v3967_v44 }
 0x157   : > { %2451 = vmatpush1.bf16.msra.mxu1 %v3962_v45  ;;  %v4036_v45 = vld [vmem:[#allocation5 + $0x7d8] ss:$156 sps:$4 sm:$0xff]  }
 0x158   : > { %2452 = vmatprep.subr.bf16.mxu1 %v3970_v46 }
 0x159   : > { %2410 = vmatpush1.bf16.msra.mxu0 %v3965_v47 }
 0x15a   : > { %2411 = vmatprep.subr.bf16.mxu0 %v3973_v48  ;;  %v4031_v48 = vld [vmem:[#allocation5 + $0x7cc] ss:$156 sps:$4 sm:$0xff]  }
 0x15b   : > { %2453 = vmatpush1.bf16.msra.mxu1 %v3968_v49 }
 0x15c   : > { %2454 = vmatprep.subr.bf16.mxu1 %v3976_v50 }
 0x15d   : > { %2412 = vmatpush1.bf16.msra.mxu0 %v3971_v51 }
 0x15e   : > { %2413 = vmatprep.subr.bf16.mxu0 %v3979_v52 }
 0x15f   : > { %2455 = vmatpush1.bf16.msra.mxu1 %v3974_v34  ;;  %v453_v56 = vpop.f32.mrb[0].mxu0  ;;  %v496_v62 = vpop.f32.mrb[0].mxu1  ;;  %v4039_v34 = vld [vmem:[#allocation5 + $0x908] ss:$156 sps:$4 sm:$0xff]  }
 0x160   : > { %v455_v58 = vpop.f32.mrb[1].mxu0  ;;  %2456 = vmatprep.subr.bf16.mxu1 %v3982_v53  ;;  %v4505_v2 = vpop.f32.mrb[1].mxu1 }
 0x161   : > { %v505_v60 = vmax.f32 %v453_v56, %v455_v58  ;;  %v457_v61 = vpop.f32.mrb[2].mxu0  ;;  %2414 = vmatpush1.bf16.msra.mxu0 %v3977_v54  ;;  %v500_v6 = vpop.f32.mrb[2].mxu1  ;;  %v4034_v54 = vld [vmem:[#allocation5 + $0x7d4] ss:$156 sps:$4 sm:$0xff]  }
 0x162   : > { %v459_v1 = vpop.f32.mrb[3].mxu0  ;;  %2415 = vmatprep.subr.bf16.mxu0 %v3985_v55  ;;  %v4509_v8 = vpop.f32.mrb[3].mxu1  ;;  %v4042_v58 = vld [vmem:[#allocation5 + $0x910] ss:$156 sps:$4 sm:$0xff]  }
 0x163   : > { %v4507_v4 = vmax.f32 %v505_v60, %v496_v62  ;;  %v506_v5 = vmax.f32 %v457_v61, %v459_v1  ;;  %2457 = vmatpush1.bf16.msra.mxu1 %v3980_v57  ;;  %v4045_v62 = vld [vmem:[#allocation5 + $0x90] ss:$156 sps:$4 sm:$0xff]  }
 0x164   : > { %2458 = vmatprep.subr.bf16.mxu1 %v3988_v59  ;;  %v4037_v59 = vld [vmem:[#allocation5 + $0x904] ss:$156 sps:$4 sm:$0xff]  }
 0x165   : > { %v509_v11 = vmax.f32 %v4507_v4, %v4505_v2  ;;  %v4513_v12 = vmax.f32 %v506_v5, %v500_v6  ;;  %2416 = vmatpush1.bf16.msra.mxu0 %v3983_v63  ;;  %v4040_v63 = vld [vmem:[#allocation5 + $0x90c] ss:$156 sps:$4 sm:$0xff]   ;;  %v4048_v2 = vld [vmem:[#allocation5 + $0x98] ss:$156 sps:$4 sm:$0xff]  }
 0x166   : > { %2417 = vmatprep.subr.bf16.mxu0 %v3991_v3  ;;  %v4043_v3 = vld [vmem:[#allocation5 + $0x8c] ss:$156 sps:$4 sm:$0xff]   ;;  %v4046_v5 = vld [vmem:[#allocation5 + $0x94] ss:$156 sps:$4 sm:$0xff]  }
 0x167   : > { %v510_v15 = vmax.f32 %v4513_v12, %v4509_v8  ;;  %2459 = vmatpush1.bf16.msra.mxu1 %v3986_v7  ;;  %v4051_v4 = vld [vmem:[#allocation5 + $0x1c8] ss:$156 sps:$4 sm:$0xff]   ;;  %v4054_v6 = vld [vmem:[#allocation5 + $0x1d0] ss:$156 sps:$4 sm:$0xff]   ;;  %v4057_v8 = vld [vmem:[#allocation5 + $0x300] ss:$156 sps:$4 sm:$0xff]  }
 0x168   : > { %2460 = vmatprep.subr.bf16.mxu1 %v3994_v9  ;;  %v4049_v7 = vld [vmem:[#allocation5 + $0x1c4] ss:$156 sps:$4 sm:$0xff]   ;;  %v4052_v9 = vld [vmem:[#allocation5 + $0x1cc] ss:$156 sps:$4 sm:$0xff]   ;;  %v4055_v12 = vld [vmem:[#allocation5 + $0x2fc] ss:$156 sps:$4 sm:$0xff]  }
 0x169   : > { %2418 = vmatpush1.bf16.msra.mxu0 %v3989_v13  ;;  %v4063_v13 = vld [vmem:[#allocation5 + $0x438] ss:$156 sps:$4 sm:$0xff]  }
 0x16a   : > { %2687 = vmatprep.subr.bf16.mxu0 %v3997_v14  ;;  %v4058_v14 = vld [vmem:[#allocation5 + $0x304] ss:$156 sps:$4 sm:$0xff]  }
 0x16b   : > { %2461 = vmatpush1.bf16.msra.mxu1 %v3992_v16  ;;  %v4061_v16 = vld [vmem:[#allocation5 + $0x434] ss:$156 sps:$4 sm:$0xff]  }
 0x16c   : > { %2436 = vmatmul.mubr.bf16.vlgmr.msra.gmra.mrb[28].mxu0 %v4496_v10  ;;  %2730 = vmatprep.subr.bf16.mxu1 %v4000_v17  ;;  %v4069_v17 = vld [vmem:[#allocation5 + $0x570] ss:$156 sps:$4 sm:$0xff]  }
 0x16d   : > { %2688 = vmatpush1.bf16.msra.mxu0 %v3995_v18  ;;  %2719 = vmatprep.mubr.bf16.mxu0 %v4257_v0  ;;  %v4064_v18 = vld [vmem:[#allocation5 + $0x43c] ss:$156 sps:$4 sm:$0xff]  }
 0x16e   : > { %2479 = vmatmul.mubr.bf16.vlgmr.msra.gmra.mrb[28].mxu1 %v4496_v10  ;;  %2689 = vmatprep.subr.bf16.mxu0 %v4003_v19  ;;  %v4072_v19 = vld [vmem:[#allocation5 + $0x578] ss:$156 sps:$4 sm:$0xff]  }
 0x16f   : > { %2731 = vmatpush1.bf16.msra.mxu1 %v3998_v20  ;;  %2762 = vmatprep.mubr.bf16.mxu1 %v4257_v0  ;;  %v4075_v20 = vld [vmem:[#allocation5 + $0x6a8] ss:$156 sps:$4 sm:$0xff]  }
 0x170   : > { %2732 = vmatprep.subr.bf16.mxu1 %v4006_v21  ;;  %v4070_v21 = vld [vmem:[#allocation5 + $0x574] ss:$156 sps:$4 sm:$0xff]  }
 0x171   : > { %2690 = vmatpush1.bf16.msra.mxu0 %v4001_v22  ;;  %v4078_v22 = vld [vmem:[#allocation5 + $0x6b0] ss:$156 sps:$4 sm:$0xff]  }
 0x172   : > { %2691 = vmatprep.subr.bf16.mxu0 %v4009_v23  ;;  %v4073_v23 = vld [vmem:[#allocation5 + $0x6a4] ss:$156 sps:$4 sm:$0xff]  }
 0x173   : > { %2733 = vmatpush1.bf16.msra.mxu1 %v4004_v24  ;;  %v4081_v24 = vld [vmem:[#allocation5 + $0x7e0] ss:$156 sps:$4 sm:$0xff]  }
 0x174   : > { %2734 = vmatprep.subr.bf16.mxu1 %v4012_v25 }
 0x175   : > { %2692 = vmatpush1.bf16.msra.mxu0 %v4007_v26  ;;  %v4076_v26 = vld [vmem:[#allocation5 + $0x6ac] ss:$156 sps:$4 sm:$0xff]  }
 0x176   : > { %2693 = vmatprep.subr.bf16.mxu0 %v4015_v27 }
 0x177   : > { %2735 = vmatpush1.bf16.msra.mxu1 %v4010_v28 }
 0x178   : > { %2736 = vmatprep.subr.bf16.mxu1 %v4018_v29  ;;  %v4084_v29 = vld [vmem:[#allocation5 + $0x7e8] ss:$156 sps:$4 sm:$0xff]  }
 0x179   : > { %2694 = vmatpush1.bf16.msra.mxu0 %v4013_v30 }
 0x17a   : > { %2695 = vmatprep.subr.bf16.mxu0 %v4021_v31 }
 0x17b   : > { %2737 = vmatpush1.bf16.msra.mxu1 %v4016_v32  ;;  %v4079_v32 = vld [vmem:[#allocation5 + $0x7dc] ss:$156 sps:$4 sm:$0xff]  }
 0x17c   : > { %2738 = vmatprep.subr.bf16.mxu1 %v4024_v33 }
 0x17d   : > { %2696 = vmatpush1.bf16.msra.mxu0 %v4019_v35 }
 0x17e   : > { %2697 = vmatprep.subr.bf16.mxu0 %v4027_v36 }
 0x17f   : > { %2739 = vmatpush1.bf16.msra.mxu1 %v4022_v37  ;;  %v737_v41 = vpop.f32.mrb[4].mxu0 }
 0x180   : > { %v789_v43 = vmax.f32 %v509_v11, %v737_v41  ;;  %v739_v44 = vpop.f32.mrb[5].mxu0  ;;  %2740 = vmatprep.subr.bf16.mxu1 %v4030_v38  ;;  %v4060_v11 = vld [vmem:[#allocation5 + $0x308] ss:$156 sps:$4 sm:$0xff]   ;;  %v4087_v38 = vld [vmem:[#allocation5 + $0x918] ss:$156 sps:$4 sm:$0xff]  }
 0x181   : > { %v741_v46 = vpop.f32.mrb[6].mxu0  ;;  %v780_v47 = vpop.f32.mrb[4].mxu1  ;;  %2698 = vmatpush1.bf16.msra.mxu0 %v4025_v39 }
 0x182   : > { %v791_v49 = vmax.f32 %v789_v43, %v739_v44  ;;  %v790_v50 = vmax.f32 %v510_v15, %v741_v46  ;;  %v743_v51 = vpop.f32.mrb[7].mxu0  ;;  %v4524_v52 = vpop.f32.mrb[5].mxu1  ;;  %2699 = vmatprep.subr.bf16.mxu0 %v4033_v40  ;;  %v4066_v15 = vld [vmem:[#allocation5 + $0x440] ss:$156 sps:$4 sm:$0xff]  }
 0x183   : > { %2741 = vmatpush1.bf16.msra.mxu1 %v4028_v42  ;;  %v784_v53 = vpop.f32.mrb[6].mxu1  ;;  %v4082_v40 = vld [vmem:[#allocation5 + $0x7e4] ss:$156 sps:$4 sm:$0xff]  }
 0x184   : > { %v4526_v55 = vmax.f32 %v791_v49, %v780_v47  ;;  %v792_v56 = vmax.f32 %v790_v50, %v743_v51  ;;  %v4528_v57 = vpop.f32.mrb[7].mxu1  ;;  %2742 = vmatprep.subr.bf16.mxu1 %v4036_v45  ;;  %v4090_v44 = vld [vmem:[#allocation5 + $0x920] ss:$156 sps:$4 sm:$0xff]   ;;  %v4085_v45 = vld [vmem:[#allocation5 + $0x914] ss:$156 sps:$4 sm:$0xff]  }
 0x185   : > { %2700 = vmatpush1.bf16.msra.mxu0 %v4031_v48  ;;  %v4088_v48 = vld [vmem:[#allocation5 + $0x91c] ss:$156 sps:$4 sm:$0xff]  }
 0x186   : > { %v795_v60 = vmax.f32 %v4526_v55, %v4524_v52  ;;  %v4532_v61 = vmax.f32 %v792_v56, %v784_v53  ;;  %2701 = vmatprep.subr.bf16.mxu0 %v4039_v34  ;;  %v3310_v34 = vld [vmem:[#allocation7] ss:$0 sm:$0xff] }
 0x187   : > { %2743 = vmatpush1.bf16.msra.mxu1 %v4034_v54 }
 0x188   : > { %v796_v1 = vmax.f32 %v4532_v61, %v4528_v57  ;;  %2744 = vmatprep.subr.bf16.mxu1 %v4042_v58 }
 0x189   : > { %2702 = vmatpush1.bf16.msra.mxu0 %v4037_v59 }
 0x18a   : > { %2973 = vmatprep.subr.bf16.mxu0 %v4045_v62 }
 0x18b   : > { %2745 = vmatpush1.bf16.msra.mxu1 %v4040_v63 }
 0x18c   : > { %2720 = vmatmul.mubr.bf16.vlgmr.msra.gmra.mrb[32].mxu0 %v4496_v10  ;;  %3016 = vmatprep.subr.bf16.mxu1 %v4048_v2 }
 0x18d   : > { %2974 = vmatpush1.bf16.msra.mxu0 %v4043_v3  ;;  %3005 = vmatprep.mubr.bf16.mxu0 %v4257_v0 }
 0x18e   : > { %2763 = vmatmul.mubr.bf16.vlgmr.msra.gmra.mrb[32].mxu1 %v4496_v10  ;;  %2975 = vmatprep.subr.bf16.mxu0 %v4051_v4 }
 0x18f   : > { %3017 = vmatpush1.bf16.msra.mxu1 %v4046_v5  ;;  %3048 = vmatprep.mubr.bf16.mxu1 %v4257_v0  ;;  %v4067_v0 = vld [vmem:[#allocation5 + $0x56c] ss:$156 sps:$4 sm:$0xff]  }
 0x190   : > { %3018 = vmatprep.subr.bf16.mxu1 %v4054_v6 }
 0x191   : > { %2976 = vmatpush1.bf16.msra.mxu0 %v4049_v7 }
 0x192   : > { %2977 = vmatprep.subr.bf16.mxu0 %v4057_v8 }
 0x193   : > { %3019 = vmatpush1.bf16.msra.mxu1 %v4052_v9 }
 0x194   : > { %3020 = vmatprep.subr.bf16.mxu1 %v4060_v11 }
 0x195   : > { %2978 = vmatpush1.bf16.msra.mxu0 %v4055_v12 }
 0x196   : > { %2979 = vmatprep.subr.bf16.mxu0 %v4063_v13 }
 0x197   : > { %3021 = vmatpush1.bf16.msra.mxu1 %v4058_v14 }
 0x198   : > { %3022 = vmatprep.subr.bf16.mxu1 %v4066_v15 }
 0x199   : > { %2980 = vmatpush1.bf16.msra.mxu0 %v4061_v16 }
 0x19a   : > { %2981 = vmatprep.subr.bf16.mxu0 %v4069_v17 }
 0x19b   : > { %3023 = vmatpush1.bf16.msra.mxu1 %v4064_v18 }
 0x19c   : > { %3024 = vmatprep.subr.bf16.mxu1 %v4072_v19 }
 0x19d   : > { %2982 = vmatpush1.bf16.msra.mxu0 %v4067_v0 }
 0x19e   : > { %2983 = vmatprep.subr.bf16.mxu0 %v4075_v20 }
 0x19f   : > { %3025 = vmatpush1.bf16.msra.mxu1 %v4070_v21  ;;  %v1023_v25 = vpop.f32.mrb[8].mxu0 }
 0x1a0   : > { %v1075_v27 = vmax.f32 %v795_v60, %v1023_v25  ;;  %v1025_v28 = vpop.f32.mrb[9].mxu0  ;;  %3026 = vmatprep.subr.bf16.mxu1 %v4078_v22 }
 0x1a1   : > { %v1027_v30 = vpop.f32.mrb[10].mxu0  ;;  %v1066_v31 = vpop.f32.mrb[8].mxu1  ;;  %2984 = vmatpush1.bf16.msra.mxu0 %v4073_v23 }
 0x1a2   : > { %v1077_v33 = vmax.f32 %v1075_v27, %v1025_v28  ;;  %v1076_v35 = vmax.f32 %v796_v1, %v1027_v30  ;;  %v1029_v36 = vpop.f32.mrb[11].mxu0  ;;  %v1068_v37 = vpop.f32.mrb[9].mxu1  ;;  %2985 = vmatprep.subr.bf16.mxu0 %v4081_v24 }
 0x1a3   : > { %3027 = vmatpush1.bf16.msra.mxu1 %v4076_v26  ;;  %v1070_v39 = vpop.f32.mrb[10].mxu1 }
 0x1a4   : > { %v1079_v41 = vmax.f32 %v1077_v33, %v1066_v31  ;;  %v1078_v42 = vmax.f32 %v1076_v35, %v1029_v36  ;;  %v1072_v43 = vpop.f32.mrb[11].mxu1  ;;  %3028 = vmatprep.subr.bf16.mxu1 %v4084_v29 }
 0x1a5   : > { %2986 = vmatpush1.bf16.msra.mxu0 %v4079_v32 }
 0x1a6   : > { %v1081_v46 = vmax.f32 %v1079_v41, %v1068_v37  ;;  %v1080_v47 = vmax.f32 %v1078_v42, %v1070_v39  ;;  %2987 = vmatprep.subr.bf16.mxu0 %v4087_v38 }
 0x1a7   : > { %3029 = vmatpush1.bf16.msra.mxu1 %v4082_v40 }
 0x1a8   : > { %v1082_v49 = vmax.f32 %v1080_v47, %v1072_v43  ;;  %3030 = vmatprep.subr.bf16.mxu1 %v4090_v44  ;;  %v3415_v44 = vld [vmem:[#allocation7 + $0x1] ss:$0 sm:$0xff] }
 0x1a9   : > { %2988 = vmatpush1.bf16.msra.mxu0 %v4085_v45 }
 0x1ab   : > { %3031 = vmatpush1.bf16.msra.mxu1 %v4088_v48 }
 0x1ac   : > { %3006 = vmatmul.mubr.bf16.vlgmr.msra.gmra.mrb[36].mxu0 %v4496_v10 }
 0x1ae   : > { %3049 = vmatmul.mubr.bf16.vlgmr.msra.gmra.mrb[36].mxu1 %v4496_v10 }
 0x1bf   : > { %v1213_v50 = vpop.f32.mrb[12].mxu0 }
 0x1c0   : > { %v1222_v51 = vmax.f32 %v1081_v46, %v1213_v50  ;;  %v1215_v52 = vpop.f32.mrb[13].mxu0 }
 0x1c1   : > { %v1217_v53 = vpop.f32.mrb[14].mxu0  ;;  %v1463_v54 = vpop.f32.mrb[12].mxu1 }
 0x1c2   : > { %v1224_v55 = vmax.f32 %v1222_v51, %v1215_v52  ;;  %v1223_v56 = vmax.f32 %v1082_v49, %v1217_v53  ;;  %v1219_v57 = vpop.f32.mrb[15].mxu0  ;;  %v1465_v58 = vpop.f32.mrb[13].mxu1 }
 0x1c3   : > { %v1515_v59 = vmax.f32 %v1463_v54, %v1465_v58  ;;  %v1467_v60 = vpop.f32.mrb[14].mxu1 }
 0x1c4   : > { %v1233_v61 = vadd.f32 %v3310_v34, %v1224_v55  ;;  %v1225_v62 = vmax.f32 %v1223_v56, %v1219_v57  ;;  %v1469_v63 = vpop.f32.mrb[15].mxu1 }
 0x1c5   : > { %v1516_v1 = vmax.f32 %v1467_v60, %v1469_v63 }
 0x1c6   : > { %1235 = vst [vmem:[%s4546_s20] sm:$0xff] %v1233_v61  ;;  %v1234_v10 = vadd.f32 %v3310_v34, %v1225_v62 }
 0x1c8   : > { %1236 = vst [vmem:[%s4546_s20 + $0x18] sm:$0xff] %v1234_v10 }
 0x1df   : > { %v1506_v2 = vpop.f32.mrb[16].mxu0 }
 0x1e0   : > { %v1517_v3 = vmax.f32 %v1515_v59, %v1506_v2  ;;  %v1508_v4 = vpop.f32.mrb[17].mxu0 }
 0x1e1   : > { %v1510_v5 = vpop.f32.mrb[18].mxu0  ;;  %v1747_v6 = vpop.f32.mrb[16].mxu1 }
 0x1e2   : > { %v1519_v7 = vmax.f32 %v1517_v3, %v1508_v4  ;;  %v1518_v8 = vmax.f32 %v1516_v1, %v1510_v5  ;;  %v1512_v9 = vpop.f32.mrb[19].mxu0  ;;  %v1749_v11 = vpop.f32.mrb[17].mxu1 }
 0x1e3   : > { %v1751_v12 = vpop.f32.mrb[18].mxu1 }
 0x1e4   : > { %v1799_v13 = vmax.f32 %v1519_v7, %v1747_v6  ;;  %v1520_v14 = vmax.f32 %v1518_v8, %v1512_v9  ;;  %v1753_v15 = vpop.f32.mrb[19].mxu1 }
 0x1e6   : > { %v1801_v16 = vmax.f32 %v1799_v13, %v1749_v11  ;;  %v1800_v17 = vmax.f32 %v1520_v14, %v1751_v12 }
 0x1e8   : > { %v1802_v18 = vmax.f32 %v1800_v17, %v1753_v15 }
 0x1ff   : > { %v1790_v19 = vpop.f32.mrb[20].mxu0 }
 0x200   : > { %v1803_v0 = vmax.f32 %v1801_v16, %v1790_v19  ;;  %v1792_v20 = vpop.f32.mrb[21].mxu0 }
 0x201   : > { %v1794_v21 = vpop.f32.mrb[22].mxu0  ;;  %v2033_v22 = vpop.f32.mrb[20].mxu1 }
 0x202   : > { %v1805_v23 = vmax.f32 %v1803_v0, %v1792_v20  ;;  %v1804_v24 = vmax.f32 %v1802_v18, %v1794_v21  ;;  %v1796_v25 = vpop.f32.mrb[23].mxu0  ;;  %v2035_v26 = vpop.f32.mrb[21].mxu1 }
 0x203   : > { %v2037_v27 = vpop.f32.mrb[22].mxu1 }
 0x204   : > { %v2085_v28 = vmax.f32 %v1805_v23, %v2033_v22  ;;  %v1806_v29 = vmax.f32 %v1804_v24, %v1796_v25  ;;  %v2039_v30 = vpop.f32.mrb[23].mxu1 }
 0x206   : > { %v2087_v31 = vmax.f32 %v2085_v28, %v2035_v26  ;;  %v2086_v32 = vmax.f32 %v1806_v29, %v2037_v27 }
 0x208   : > { %v2088_v33 = vmax.f32 %v2086_v32, %v2039_v30  ;;  %v3512_v30 = vld [vmem:[#allocation7 + $0x2] ss:$0 sm:$0xff] }
 0x21f   : > { %v2076_v35 = vpop.f32.mrb[24].mxu0 }
 0x220   : > { %v2089_v36 = vmax.f32 %v2087_v31, %v2076_v35  ;;  %v2078_v37 = vpop.f32.mrb[25].mxu0 }
 0x221   : > { %v2080_v38 = vpop.f32.mrb[26].mxu0  ;;  %v2191_v39 = vpop.f32.mrb[24].mxu1 }
 0x222   : > { %v2091_v40 = vmax.f32 %v2089_v36, %v2078_v37  ;;  %v2090_v41 = vmax.f32 %v2088_v33, %v2080_v38  ;;  %v2082_v42 = vpop.f32.mrb[27].mxu0  ;;  %v3546_v43 = vpop.f32.mrb[25].mxu1 }
 0x223   : > { %v2194_v45 = vpop.f32.mrb[26].mxu1 }
 0x224   : > { %v2198_v46 = vmax.f32 %v2091_v40, %v2191_v39  ;;  %v2092_v47 = vmax.f32 %v2090_v41, %v2082_v42  ;;  %v3547_v48 = vpop.f32.mrb[27].mxu1 }
 0x226   : > { %v2207_v49 = vadd.f32 %v3415_v44, %v2198_v46  ;;  %v2199_v50 = vmax.f32 %v2092_v47, %v2194_v45 }
 0x228   : > { %2209 = vst [vmem:[%s4546_s20 + $0x8] sm:$0xff] %v2207_v49  ;;  %v2208_v51 = vadd.f32 %v3415_v44, %v2199_v50 }
 0x22a   : > { %2210 = vst [vmem:[%s4546_s20 + $0x20] sm:$0xff] %v2208_v51 }
 0x23f   : > { %v2437_v52 = vpop.f32.mrb[28].mxu0 }
 0x240   : > { %v2439_v34 = vpop.f32.mrb[29].mxu0 }
 0x241   : > { %v2489_v53 = vmax.f32 %v2437_v52, %v2439_v34  ;;  %v2441_v54 = vpop.f32.mrb[30].mxu0  ;;  %v2480_v55 = vpop.f32.mrb[28].mxu1 }
 0x242   : > { %v2443_v56 = vpop.f32.mrb[31].mxu0  ;;  %v2482_v57 = vpop.f32.mrb[29].mxu1 }
 0x243   : > { %v2491_v58 = vmax.f32 %v2489_v53, %v2480_v55  ;;  %v2490_v59 = vmax.f32 %v2441_v54, %v2443_v56  ;;  %v2484_v60 = vpop.f32.mrb[30].mxu1 }
 0x244   : > { %v2486_v61 = vpop.f32.mrb[31].mxu1 }
 0x245   : > { %v2493_v62 = vmax.f32 %v2491_v58, %v2482_v57  ;;  %v2492_v63 = vmax.f32 %v2490_v59, %v2484_v60 }
 0x247   : > { %v2494_v1 = vmax.f32 %v2492_v63, %v2486_v61 }
 0x25f   : > { %v2721_v10 = vpop.f32.mrb[32].mxu0 }
 0x260   : > { %v2773_v2 = vmax.f32 %v2493_v62, %v2721_v10  ;;  %v2723_v3 = vpop.f32.mrb[33].mxu0 }
 0x261   : > { %v2725_v4 = vpop.f32.mrb[34].mxu0  ;;  %v2764_v5 = vpop.f32.mrb[32].mxu1 }
 0x262   : > { %v2775_v6 = vmax.f32 %v2773_v2, %v2723_v3  ;;  %v2774_v7 = vmax.f32 %v2494_v1, %v2725_v4  ;;  %v2727_v8 = vpop.f32.mrb[35].mxu0  ;;  %v2766_v9 = vpop.f32.mrb[33].mxu1 }
 0x263   : > { %v2768_v11 = vpop.f32.mrb[34].mxu1 }
 0x264   : > { %v2777_v12 = vmax.f32 %v2775_v6, %v2764_v5  ;;  %v2776_v13 = vmax.f32 %v2774_v7, %v2727_v8  ;;  %v2770_v14 = vpop.f32.mrb[35].mxu1 }
 0x266   : > { %v2779_v15 = vmax.f32 %v2777_v12, %v2766_v9  ;;  %v2778_v16 = vmax.f32 %v2776_v13, %v2768_v11 }
 0x268   : > { %v2780_v17 = vmax.f32 %v2778_v16, %v2770_v14 }
 0x27f   : > { %v3007_v18 = vpop.f32.mrb[36].mxu0 }
 0x280   : > { %v3059_v19 = vmax.f32 %v2779_v15, %v3007_v18  ;;  %v3009_v0 = vpop.f32.mrb[37].mxu0 }
 0x281   : > { %v3050_v20 = vpop.f32.mrb[36].mxu1  ;;  %v3011_v21 = vpop.f32.mrb[38].mxu0 }
 0x282   : > { %v3061_v22 = vmax.f32 %v3059_v19, %v3009_v0  ;;  %v3060_v23 = vmax.f32 %v2780_v17, %v3011_v21  ;;  %v3052_v24 = vpop.f32.mrb[37].mxu1  ;;  %v3013_v25 = vpop.f32.mrb[39].mxu0 }
 0x283   : > { %v3054_v26 = vpop.f32.mrb[38].mxu1 }
 0x284   : > { %v3063_v27 = vmax.f32 %v3061_v22, %v3050_v20  ;;  %v3062_v28 = vmax.f32 %v3060_v23, %v3013_v25  ;;  %v3056_v29 = vpop.f32.mrb[39].mxu1 }
 0x286   : > { %v3065_v31 = vmax.f32 %v3063_v27, %v3052_v24  ;;  %v3064_v32 = vmax.f32 %v3062_v28, %v3054_v26 }
 0x288   : > { %v3074_v33 = vadd.f32 %v3512_v30, %v3065_v31  ;;  %v3066_v35 = vmax.f32 %v3064_v32, %v3056_v29 }
 0x28a   : > { %3076 = vst [vmem:[%s4546_s20 + $0x10] sm:$0xff] %v3074_v33  ;;  %v3075_v36 = vadd.f32 %v3512_v30, %v3066_v35 }
 0x28c   : > { %3077 = vst [vmem:[%s4546_s20 + $0x28] sm:$0xff] %v3075_v36 }
 0x28d   : > { %4191 = shalt.err (!%p4188_p2)
}
 0x28e   : > { %s4192_s11 = scalar_lea.hbm %s4560_s23, 768  ;;  %s4196_s29 = scalar_lea.hbm %s4608_s3, 1536 }
 0x28f   : > { %p4193_p13 = scmp.ne.s32.totalorder %s4560_s23, %s4192_s11  ;;  %p4197_p4 = scmp.lt.u32.totalorder %s4560_s23, %s4608_s3 }
 0x290   : > { %p4198_p5 = scmp.lt.u32.totalorder %s4196_s29, %s4192_s11  ;;  %p4200_p11 = scmp.lt.u32.totalorder %s4192_s11, %s4560_s23 }
 0x291   : > { %p4194_p6 = pnand %p4193_p13, %p4622_p0 }
 0x292   : > { %p4199_p8 = por %p4198_p5, %p4197_p4 }
 0x293   : > { %p4195_p10 = pneg %p4194_p6 }
 0x294   : > { %p4201_p1 = por %p4200_p11, %p4199_p8 }
 0x296   : > { %p4202_p3 = pnand %p4201_p1, %p4195_p10 }
 0x298   : > { %4205 = shalt.err (!%p4202_p3)
}
 0x299   : > { %s4261_s18 = smov 384   ;;  %s4262_s20 = smov 24  }
 0x29a   : > { %3560 = dma.vmem_to_hbm [thread:$0]  (%p4622_p0), %s4554_s21, 768, %s4560_s23, %s3079_s6, %s4261_s18, %s4261_s18, %s4262_s20  }
 0x29b PF: > { %s3108_s26 = sand.u32 1, %s4236_s12   ;;  %p4623_p7 = scmp.ne.s32.totalorder %s4613_s19, 0 }
 0x29c   : > { %p4624_p9 = scmp.ge.s32.totalorder %s4248_s15, 2  ;;  %s3109_s27 = scalar_lea.sflag [#allocation4], %s3108_s26 }
 0x29e   : > { %p3574_p12 = pnand %p4624_p9, %p4623_p7 }
 0x2a0   : > { %4231 = dma.done.wait (!%p3574_p12), %s3109_s27, 768  }
 0x2a1   : > { %4233 = vsyncadd (!%p3574_p12), %s3109_s27, 4294966528  ;;  %p17_p2 = scmp.ge.s32.totalorder %s4394_s5, 4   ;;  %s4625_s12 = smov %s4240_s13 }
 0x2a2   : > { %s4626_s13 = smov %s4244_s14  ;;  %s4627_s14 = smov %s4410_s8 }
 0x2a3   : > { %s4628_s15 = smov %s4394_s5  ;;  %19 = sbr.rel (!%p17_p2) target bundleno = 6 (0x6), region = 85 }
 0x2aa   :  { %3114 = vsyncpa [#allocation3], 1 }
 0x2ab   :  { %3116 = vsyncpa [#allocation3 + $0x1], 1 }
 0x2ac   :  { %3117 = vsyncpa [#allocation6], 1 }
 0x2ad   :  { %3118 = vsyncpa [#allocation4], 1 }
 0x2ae   :  { %3120 = vsyncpa [#allocation4 + $0x1], 1 }

</bundles_post_ra>
